<compile_context>
chip_gen: v7x
topology: tpu7x:2x2x1
jax: 0.10.0
libtpu: 0.0.40
codegen_flags: <defaults>
</compile_context>

<pallas_src>
import functools

import jax
import jax.numpy as jnp
from jax.experimental import pallas as pl
from jax.experimental.pallas import tpu as pltpu

H = W = 28
K = 7
KK = K * K                  # 49 conv taps
PAD = 3
C_OUT = 12
P_H = P_W = 14
POOLED = P_H * P_W          # 196 pooled positions
QROWS = 200                 # 196 rounded up to a multiple of 8 (sublane aligned)
FC_IN = C_OUT * POOLED      # 2352
FC_OUT = 10
N_REP = C_OUT * FC_OUT      # 120 lane-dense width (channel c -> lanes c*10..c*10+9)
DEFAULT_BLOCK_B = 16        # samples per grid step (VMEM-safe on all generations)


def _lenet_kernel(p_ref, wc_ref, bc_ref, wf_ref, sel_ref, bf_ref, o_ref, *,
                  block_b):
    """Fused LeNet forward for a block of `block_b` samples.

    p_ref  : (4, block_b*200, 49) bf16  im2col patches, quadrant-major
    wc_ref : (49, 120)            bf16  conv weight, channel-replicated 10x
    bc_ref : (1, 120)             f32   conv bias, channel-replicated 10x
    wf_ref : (200, 120)           f32   lane-dense FC weight, rows 196..199 = 0
    sel_ref: (120, 10)            f32   12 stacked identities (group lane-sum)
    bf_ref : (1, 10)              f32   FC bias
    o_ref  : (block_b, 10)        f32   log-probabilities
    """
    # Conv for each pool quadrant; fold the 2x2 max-pool as a running maximum
    # so only one (block_b*200, 120) f32 quadrant result is live at a time.
    acc = jnp.dot(p_ref[0], wc_ref[...], preferred_element_type=jnp.float32)
    for q in range(1, 4):
        acc = jnp.maximum(
            acc, jnp.dot(p_ref[q], wc_ref[...],
                         preferred_element_type=jnp.float32))

    # Per-channel bias + ReLU commute with the max (monotone, same bias).
    pooled = jnp.maximum(acc + bc_ref[...], 0.0)            # (block_b*200, 120)

    # Lane-dense FC 2352 -> 10:
    #   elementwise multiply with the (200,120) weight slab (pad rows are 0),
    #   sublane sum over the 200 pooled rows, then a tiny selector matmul sums
    #   the 12 channel groups across lanes.
    prod = pooled.reshape(block_b, QROWS, N_REP) * wf_ref[...]
    g = jnp.sum(prod, axis=1)                                # (block_b, 120)
    logits = jnp.dot(g, sel_ref[...], preferred_element_type=jnp.float32)
    logits = logits + bf_ref[...]                            # (block_b, 10)

    # log_softmax over the class axis.
    m = jnp.max(logits, axis=-1, keepdims=True)
    z = logits - m
    lse = jnp.log(jnp.sum(jnp.exp(z), axis=-1, keepdims=True))
    o_ref[...] = z - lse


def _stride1_patches(x):
    """(B,1,28,28) -> replicate-padded im2col patches (B,28,28,49) via slicing."""
    xp = jnp.pad(x[:, 0], ((0, 0), (PAD, PAD), (PAD, PAD)), mode="edge")
    cols = [xp[:, ky:ky + H, kx:kx + W] for ky in range(K) for kx in range(K)]
    return jnp.stack(cols, axis=-1)


def _quadrant_patches(x):
    """(B,1,28,28) -> (4, B*200, 49).

    Quadrant-major patch blocks; within a sample's 200-row block, row
    p = i*14 + j is pooled position (i, j); rows 196..199 are zero padding so
    every block start stays sublane aligned.
    """
    B = x.shape[0]
    patches = _stride1_patches(x)                            # (B,28,28,49)
    blocks = []
    for dy in (0, 1):
        for dx in (0, 1):
            q = patches[:, dy::2, dx::2, :].reshape(B, POOLED, KK)
            q = jnp.pad(q, ((0, 0), (0, QROWS - POOLED), (0, 0)))
            blocks.append(q.reshape(B * QROWS, KK))
    return jnp.stack(blocks, axis=0)                         # (4, B*200, 49)


@functools.partial(jax.jit, static_argnames=("block_b",))
def lenet_forward(x, w_conv, b_conv, w_fc, b_fc, *, block_b=DEFAULT_BLOCK_B):
    """Pallas forward pass matching the PyTorch LeNet.forward semantics."""
    B = x.shape[0]
    block_b = min(block_b, B)                 # don't over-pad tiny batches
    b_pad = -(-B // block_b) * block_b

    # bf16 BEFORE the im2col stack halves host-side prep HBM traffic.
    x_b = x.astype(jnp.bfloat16)
    if b_pad != B:
        x_b = jnp.pad(x_b, ((0, b_pad - B), (0, 0), (0, 0), (0, 0)))
    patches = _quadrant_patches(x_b)                              # (4, b_pad*200, 49)

    # Conv weight / bias, channel-replicated 10x across lanes: column c*10+o
    # holds conv channel c (free on the MXU, makes the FC lane-dense).
    wc = jnp.repeat(w_conv.reshape(C_OUT, KK).T, FC_OUT,
                    axis=1).astype(jnp.bfloat16)                  # (49, 120)
    bc = jnp.repeat(b_conv, FC_OUT).reshape(1, N_REP).astype(jnp.float32)

    # Lane-dense FC weight: wf2[p, c*10+o] = w_fc[o, c*196+p]; rows 196..199 = 0
    # (PyTorch flatten is channel-major, so the (o, c, p) reshape is exact).
    wf2 = jnp.transpose(w_fc.reshape(FC_OUT, C_OUT, POOLED), (2, 1, 0))
    wf2 = wf2.reshape(POOLED, N_REP).astype(jnp.float32)
    wf2 = jnp.pad(wf2, ((0, QROWS - POOLED), (0, 0)))             # (200, 120)

    # Group lane-sum selector: 12 stacked 10x10 identities.
    sel = jnp.tile(jnp.eye(FC_OUT, dtype=jnp.float32), (C_OUT, 1))  # (120, 10)
    bf = b_fc.reshape(1, FC_OUT).astype(jnp.float32)

    grid = (b_pad // block_b,)
    kernel = functools.partial(_lenet_kernel, block_b=block_b)

    out = pl.pallas_call(
        kernel,
        out_shape=jax.ShapeDtypeStruct((b_pad, FC_OUT), jnp.float32),
        grid=grid,
        in_specs=[
            pl.BlockSpec((4, block_b * QROWS, KK), lambda g: (0, g, 0)),  # patches
            pl.BlockSpec((KK, N_REP), lambda g: (0, 0)),                  # conv W
            pl.BlockSpec((1, N_REP), lambda g: (0, 0)),                   # conv b
            pl.BlockSpec((QROWS, N_REP), lambda g: (0, 0)),               # fc W
            pl.BlockSpec((N_REP, FC_OUT), lambda g: (0, 0)),              # selector
            pl.BlockSpec((1, FC_OUT), lambda g: (0, 0)),                  # fc b
        ],
        out_specs=pl.BlockSpec((block_b, FC_OUT), lambda g: (g, 0)),
        compiler_params=pltpu.CompilerParams(
            dimension_semantics=("parallel",),
            vmem_limit_bytes=32 * 1024 * 1024,
        ),
    )(patches, wc, bc, wf2, sel, bf)
    return out[:B]


def lenet_reference(x, w_conv, b_conv, w_fc, b_fc):
    """Pure-JAX f32 reference reproducing the PyTorch forward for validation."""
    B = x.shape[0]
    patches = _stride1_patches(x)                                  # (B,28,28,49)
    conv = jnp.einsum("bhwk,ok->bhwo", patches,
                      w_conv.reshape(C_OUT, KK)) + b_conv          # (B,28,28,12)
    conv = jnp.maximum(conv, 0.0)
    pooled = jnp.max(conv.reshape(B, P_H, 2, P_W, 2, C_OUT), axis=(2, 4))
    flat = jnp.transpose(pooled, (0, 3, 1, 2)).reshape(B, FC_IN)   # channel-major
    logits = flat @ w_fc.T + b_fc
    return jax.nn.log_softmax(logits, axis=-1)


if __name__ == "__main__":
    key = jax.random.PRNGKey(0)
    k1, k2, k3, k4, k5 = jax.random.split(key, 5)

    B = 2
    # fc1 expects 12 * 14 * 14 features, which fixes the spatial size to 28x28.
    x = jax.random.normal(k1, (B, 1, 28, 28), jnp.float32)
    w_conv = jax.random.normal(k2, (C_OUT, 1, K, K), jnp.float32) * 0.1
    b_conv = jax.random.normal(k3, (C_OUT,), jnp.float32) * 0.1
    w_fc = jax.random.normal(k4, (FC_OUT, FC_IN), jnp.float32) * 0.02
    b_fc = jax.random.normal(k5, (FC_OUT,), jnp.float32) * 0.02

    out = jax.block_until_ready(lenet_forward(x, w_conv, b_conv, w_fc, b_fc))
    ref = jax.block_until_ready(lenet_reference(x, w_conv, b_conv, w_fc, b_fc))

    assert out.shape == (B, FC_OUT)
    # bf16 conv operands (MXU-native) => small tolerance; epilogue is all f32.
    assert jnp.allclose(out, ref, atol=2e-2, rtol=2e-2), "mismatch vs reference"
    print("KERNEL_OK")
</pallas_src>

<mosaic_0001>
module attributes {stable_mosaic.version = 11 : i64} {
  func.func @_lenet_kernel(%arg0: i32, %arg1: memref<4x400x49xbf16, #tpu.memory_space<vmem>>, %arg2: memref<49x120xbf16, #tpu.memory_space<vmem>>, %arg3: memref<1x120xf32, #tpu.memory_space<vmem>>, %arg4: memref<200x120xf32, #tpu.memory_space<vmem>>, %arg5: memref<120x10xf32, #tpu.memory_space<vmem>>, %arg6: memref<1x10xf32, #tpu.memory_space<vmem>>, %arg7: memref<2x10xf32, #tpu.memory_space<vmem>>) attributes {dimension_semantics = [#tpu.dimension_semantics<parallel>], iteration_bounds = array<i64: 1>, scalar_prefetch = 0 : i64, scratch_operands = 0 : i64, tpu.core_type = #tpu.core_type<tc>, window_params = [{transform_indices = @transform_0, window_bounds = array<i64: 4, 400, 49>}, {pipeline_mode = #tpu.pipeline_mode<synchronous>, transform_indices = @transform_1, window_bounds = array<i64: 49, 120>}, {pipeline_mode = #tpu.pipeline_mode<synchronous>, transform_indices = @transform_2, window_bounds = array<i64: 1, 120>}, {pipeline_mode = #tpu.pipeline_mode<synchronous>, transform_indices = @transform_3, window_bounds = array<i64: 200, 120>}, {pipeline_mode = #tpu.pipeline_mode<synchronous>, transform_indices = @transform_4, window_bounds = array<i64: 120, 10>}, {pipeline_mode = #tpu.pipeline_mode<synchronous>, transform_indices = @transform_5, window_bounds = array<i64: 1, 10>}, {transform_indices = @transform_6, window_bounds = array<i64: 2, 10>}]} {
    %c0 = arith.constant 0 : index
    %c0_0 = arith.constant 0 : index
    %c0_1 = arith.constant 0 : index
    %0 = vector.load %arg1[%c0, %c0_0, %c0_1] : memref<4x400x49xbf16, #tpu.memory_space<vmem>>, vector<1x400x49xbf16>
    %1 = vector.shape_cast %0 : vector<1x400x49xbf16> to vector<400x49xbf16>
    %c0_2 = arith.constant 0 : index
    %c0_3 = arith.constant 0 : index
    %2 = vector.load %arg2[%c0_2, %c0_3] : memref<49x120xbf16, #tpu.memory_space<vmem>>, vector<49x120xbf16>
    %cst = arith.constant dense<0.000000e+00> : vector<400x120xf32>
    %3 = tpu.matmul %1, %2, %cst {dimension_numbers = #tpu.dot_dimension_numbers<[1], [0], [0], [1], [0, 0, 1, 1], [], []>} : vector<400x49xbf16>, vector<49x120xbf16>, vector<400x120xf32> -> vector<400x120xf32>
    %c1 = arith.constant 1 : index
    %c0_4 = arith.constant 0 : index
    %c0_5 = arith.constant 0 : index
    %4 = vector.load %arg1[%c1, %c0_4, %c0_5] : memref<4x400x49xbf16, #tpu.memory_space<vmem>>, vector<1x400x49xbf16>
    %5 = vector.shape_cast %4 : vector<1x400x49xbf16> to vector<400x49xbf16>
    %c0_6 = arith.constant 0 : index
    %c0_7 = arith.constant 0 : index
    %6 = vector.load %arg2[%c0_6, %c0_7] : memref<49x120xbf16, #tpu.memory_space<vmem>>, vector<49x120xbf16>
    %cst_8 = arith.constant dense<0.000000e+00> : vector<400x120xf32>
    %7 = tpu.matmul %5, %6, %cst_8 {dimension_numbers = #tpu.dot_dimension_numbers<[1], [0], [0], [1], [0, 0, 1, 1], [], []>} : vector<400x49xbf16>, vector<49x120xbf16>, vector<400x120xf32> -> vector<400x120xf32>
    %8 = arith.maximumf %3, %7 : vector<400x120xf32>
    %c2 = arith.constant 2 : index
    %c0_9 = arith.constant 0 : index
    %c0_10 = arith.constant 0 : index
    %9 = vector.load %arg1[%c2, %c0_9, %c0_10] : memref<4x400x49xbf16, #tpu.memory_space<vmem>>, vector<1x400x49xbf16>
    %10 = vector.shape_cast %9 : vector<1x400x49xbf16> to vector<400x49xbf16>
    %c0_11 = arith.constant 0 : index
    %c0_12 = arith.constant 0 : index
    %11 = vector.load %arg2[%c0_11, %c0_12] : memref<49x120xbf16, #tpu.memory_space<vmem>>, vector<49x120xbf16>
    %cst_13 = arith.constant dense<0.000000e+00> : vector<400x120xf32>
    %12 = tpu.matmul %10, %11, %cst_13 {dimension_numbers = #tpu.dot_dimension_numbers<[1], [0], [0], [1], [0, 0, 1, 1], [], []>} : vector<400x49xbf16>, vector<49x120xbf16>, vector<400x120xf32> -> vector<400x120xf32>
    %13 = arith.maximumf %8, %12 : vector<400x120xf32>
    %c3 = arith.constant 3 : index
    %c0_14 = arith.constant 0 : index
    %c0_15 = arith.constant 0 : index
    %14 = vector.load %arg1[%c3, %c0_14, %c0_15] : memref<4x400x49xbf16, #tpu.memory_space<vmem>>, vector<1x400x49xbf16>
    %15 = vector.shape_cast %14 : vector<1x400x49xbf16> to vector<400x49xbf16>
    %c0_16 = arith.constant 0 : index
    %c0_17 = arith.constant 0 : index
    %16 = vector.load %arg2[%c0_16, %c0_17] : memref<49x120xbf16, #tpu.memory_space<vmem>>, vector<49x120xbf16>
    %cst_18 = arith.constant dense<0.000000e+00> : vector<400x120xf32>
    %17 = tpu.matmul %15, %16, %cst_18 {dimension_numbers = #tpu.dot_dimension_numbers<[1], [0], [0], [1], [0, 0, 1, 1], [], []>} : vector<400x49xbf16>, vector<49x120xbf16>, vector<400x120xf32> -> vector<400x120xf32>
    %18 = arith.maximumf %13, %17 : vector<400x120xf32>
    %c0_19 = arith.constant 0 : index
    %c0_20 = arith.constant 0 : index
    %19 = vector.load %arg3[%c0_19, %c0_20] : memref<1x120xf32, #tpu.memory_space<vmem>>, vector<1x120xf32>
    %20 = vector.broadcast %19 : vector<1x120xf32> to vector<400x120xf32>
    %21 = arith.addf %18, %20 : vector<400x120xf32>
    %cst_21 = arith.constant 0.000000e+00 : f32
    %22 = vector.broadcast %cst_21 : f32 to vector<400x120xf32>
    %23 = arith.maximumf %21, %22 : vector<400x120xf32>
    %24 = vector.shape_cast %23 : vector<400x120xf32> to vector<2x200x120xf32>
    %c0_22 = arith.constant 0 : index
    %c0_23 = arith.constant 0 : index
    %25 = vector.load %arg4[%c0_22, %c0_23] : memref<200x120xf32, #tpu.memory_space<vmem>>, vector<200x120xf32>
    %26 = vector.shape_cast %25 : vector<200x120xf32> to vector<1x200x120xf32>
    %27 = vector.broadcast %26 : vector<1x200x120xf32> to vector<2x200x120xf32>
    %28 = arith.mulf %24, %27 : vector<2x200x120xf32>
    %cst_24 = arith.constant dense<0.000000e+00> : vector<2x120xf32>
    %29 = vector.multi_reduction <add>, %28, %cst_24 [1] : vector<2x200x120xf32> to vector<2x120xf32>
    %c0_25 = arith.constant 0 : index
    %c0_26 = arith.constant 0 : index
    %30 = vector.load %arg5[%c0_25, %c0_26] : memref<120x10xf32, #tpu.memory_space<vmem>>, vector<120x10xf32>
    %cst_27 = arith.constant dense<0.000000e+00> : vector<2x10xf32>
    %31 = tpu.matmul %29, %30, %cst_27 {dimension_numbers = #tpu.dot_dimension_numbers<[1], [0], [0], [1], [0, 0, 1, 1], [], []>} : vector<2x120xf32>, vector<120x10xf32>, vector<2x10xf32> -> vector<2x10xf32>
    %c0_28 = arith.constant 0 : index
    %c0_29 = arith.constant 0 : index
    %32 = vector.load %arg6[%c0_28, %c0_29] : memref<1x10xf32, #tpu.memory_space<vmem>>, vector<1x10xf32>
    %33 = vector.broadcast %32 : vector<1x10xf32> to vector<2x10xf32>
    %34 = arith.addf %31, %33 : vector<2x10xf32>
    %cst_30 = arith.constant dense<0xFF800000> : vector<2xf32>
    %35 = vector.multi_reduction <maximumf>, %34, %cst_30 [1] : vector<2x10xf32> to vector<2xf32>
    %36 = vector.shape_cast %35 : vector<2xf32> to vector<2x1xf32>
    %37 = vector.broadcast %36 : vector<2x1xf32> to vector<2x10xf32>
    %38 = arith.subf %34, %37 : vector<2x10xf32>
    %39 = math.exp %38 : vector<2x10xf32>
    %cst_31 = arith.constant dense<0.000000e+00> : vector<2xf32>
    %40 = vector.multi_reduction <add>, %39, %cst_31 [1] : vector<2x10xf32> to vector<2xf32>
    %41 = vector.shape_cast %40 : vector<2xf32> to vector<2x1xf32>
    %42 = math.log %41 : vector<2x1xf32>
    %43 = vector.broadcast %42 : vector<2x1xf32> to vector<2x10xf32>
    %44 = arith.subf %38, %43 : vector<2x10xf32>
    %c0_32 = arith.constant 0 : index
    %c0_33 = arith.constant 0 : index
    %45 = vector.load %arg7[%c0_32, %c0_33] : memref<2x10xf32, #tpu.memory_space<vmem>>, vector<2x10xf32>
    tpu.vector_store %arg7[%c0_32, %c0_33], %44 {strides = array<i32>} : memref<2x10xf32, #tpu.memory_space<vmem>>, vector<2x10xf32>,
    return
  }
  func.func @transform_0(%arg0: i32) -> (i32, i32, i32) {
    %c0_i32 = arith.constant 0 : i32
    %c0_i32_0 = arith.constant 0 : i32
    %c0_i32_1 = arith.constant 0 : i32
    return %c0_i32, %arg0, %c0_i32_0 : i32, i32, i32
  }
  func.func @transform_1(%arg0: i32) -> (i32, i32) {
    %c0_i32 = arith.constant 0 : i32
    %c0_i32_0 = arith.constant 0 : i32
    %c0_i32_1 = arith.constant 0 : i32
    return %c0_i32, %c0_i32_0 : i32, i32
  }
  func.func @transform_2(%arg0: i32) -> (i32, i32) {
    %c0_i32 = arith.constant 0 : i32
    %c0_i32_0 = arith.constant 0 : i32
    %c0_i32_1 = arith.constant 0 : i32
    return %c0_i32, %c0_i32_0 : i32, i32
  }
  func.func @transform_3(%arg0: i32) -> (i32, i32) {
    %c0_i32 = arith.constant 0 : i32
    %c0_i32_0 = arith.constant 0 : i32
    %c0_i32_1 = arith.constant 0 : i32
    return %c0_i32, %c0_i32_0 : i32, i32
  }
  func.func @transform_4(%arg0: i32) -> (i32, i32) {
    %c0_i32 = arith.constant 0 : i32
    %c0_i32_0 = arith.constant 0 : i32
    %c0_i32_1 = arith.constant 0 : i32
    return %c0_i32, %c0_i32_0 : i32, i32
  }
  func.func @transform_5(%arg0: i32) -> (i32, i32) {
    %c0_i32 = arith.constant 0 : i32
    %c0_i32_0 = arith.constant 0 : i32
    %c0_i32_1 = arith.constant 0 : i32
    return %c0_i32, %c0_i32_0 : i32, i32
  }
  func.func @transform_6(%arg0: i32) -> (i32, i32) {
    %c0_i32 = arith.constant 0 : i32
    %c0_i32_0 = arith.constant 0 : i32
    return %arg0, %c0_i32 : i32, i32
  }
}

</mosaic_0001>

<bundles_post_ra>
// kernel: tile.9
= control target key start
LH: loop header
LB: loop body
LE: loop exit
PB: predicated region body
PF: predicated region fallthrough
CT: control target
= control target key end

     0   :  { %s77_s6 = smov 3  ;;  %s47_s9 = smov 3  ;;  %vm6_vm0 = vcmask 1043458   ;;  %vm10_vm1 = vcmask 1045508   ;;  %vm14_vm2 = vcmask 1047558   ;;  %vm16_vm3 = vcmask 80896   ;;  %s748_s0 = inlined_call_operand.vmem [shape: f32[12,10,10], index: 0, kind: input, shape index: {}]   ;;  %s749_s1 = inlined_call_operand.vmem [shape: f32[120,10], index: 1, kind: output, shape index: {}]  }
   0x1   :  { %v366_v0 = vld [vmem:[%s748_s0 + $0x8a] ss:$16 sm:%s77_s6]   ;;  %s433_s10 = smov 100   ;;  %v360_v1 = vld [vmem:[%s748_s0 + $0x8b] ss:$16 sm:%s47_s9]   ;;  %s55_s13 = smov 3 }
   0x2   :  { %79 = vrot.lane.b32.xlu1 %v366_v0, %s433_s10  ;;  %s58_s14 = smov 12  ;;  %s434_s15 = smov 110   ;;  %v362_v2 = vld [vmem:[%s748_s0 + $0xa] ss:$16 sm:%s55_s13]   ;;  %vm44_vm4 = vcmask 982896   ;;  %vm74_vm5 = vcmask 900896  }
   0x3   :  { %49 = vrot.lane.b32.xlu0 %v360_v1, %s434_s15  ;;  %s63_s18 = smov 48  ;;  %s68_s19 = smov 192  ;;  %v363_v3 = vld [vmem:[%s748_s0 + $0xa] ss:$16 sm:%s58_s14]   ;;  %vm104_vm6 = vcmask 818896   ;;  %vm134_vm7 = vcmask 736896  }
   0x4   :  { %v364_v4 = vld [vmem:[%s748_s0 + $0xa] ss:$16 sm:%s63_s18]   ;;  %s25_s24 = smov 3  ;;  %s28_s25 = smov 12  ;;  %v61_v5 = vsel %vm6_vm0, %v363_v3, %v362_v2  ;;  %vm164_vm8 = vcmask 654896   ;;  %vm194_vm9 = vcmask 572896  }
   0x5   :  { %v365_v6 = vld [vmem:[%s748_s0 + $0xa] ss:$16 sm:%s68_s19]   ;;  %v356_v7 = vld [vmem:[%s748_s0 + $0xb] ss:$16 sm:%s25_s24]   ;;  %s33_s30 = smov 48  ;;  %s38_s2 = smov 192  ;;  %v66_v8 = vsel %vm10_vm1, %v364_v4, %v61_v5 }
   0x6   :  { %v357_v9 = vld [vmem:[%s748_s0 + $0xb] ss:$16 sm:%s28_s25]   ;;  %s107_s7 = smov 3  ;;  %v71_v11 = vsel %vm14_vm2, %v365_v6, %v66_v8  ;;  %s85_s13 = smov 3  ;;  %vm224_vm10 = vcmask 490896   ;;  %vm254_vm11 = vcmask 408896  }
   0x7   :  { %v358_v10 = vld [vmem:[%s748_s0 + $0xb] ss:$16 sm:%s33_s30]   ;;  %v31_v12 = vsel %vm6_vm0, %v357_v9, %v356_v7  ;;  %v372_v14 = vld [vmem:[%s748_s0 + $0x89] ss:$16 sm:%s107_s7]   ;;  %s88_s14 = smov 12  ;;  %s93_s17 = smov 48 }
   0x8   :  { %v359_v13 = vld [vmem:[%s748_s0 + $0xb] ss:$16 sm:%s38_s2]   ;;  %72 = vrot.lane.b32.xlu1 %v71_v11, %s433_s10  ;;  %v36_v15 = vsel %vm10_vm1, %v358_v10, %v31_v12  ;;  %s98_s18 = smov 192  ;;  %s137_s23 = smov 3  ;;  %vm284_vm12 = vcmask 326896   ;;  %vm314_vm13 = vcmask 244896  }
   0x9   :  { %v368_v16 = vld [vmem:[%s748_s0 + $0x9] ss:$16 sm:%s85_s13]   ;;  %v41_v17 = vsel %vm14_vm2, %v359_v13, %v36_v15  ;;  %s115_s25 = smov 3  ;;  %s118_s26 = smov 12  ;;  %v378_v23 = vld [vmem:[%s748_s0 + $0x88] ss:$16 sm:%s137_s23]  }
   0xa   :  { %v369_v18 = vld [vmem:[%s748_s0 + $0x9] ss:$16 sm:%s88_s14]   ;;  %42 = vrot.lane.b32.xlu0 %v41_v17, %s434_s15  ;;  %s123_s2 = smov 48  ;;  %s128_s3 = smov 192  ;;  %vm344_vm14 = vcmask 162896  }
   0xb   :  { %v370_v19 = vld [vmem:[%s748_s0 + $0x9] ss:$16 sm:%s93_s17]   ;;  %v91_v20 = vsel %vm6_vm0, %v369_v18, %v368_v16  ;;  %v374_v24 = vld [vmem:[%s748_s0 + $0x8] ss:$16 sm:%s115_s25]   ;;  %s435_s4 = smov 90   ;;  %s167_s7 = smov 3 }
   0xc   :  { %v371_v21 = vld [vmem:[%s748_s0 + $0x9] ss:$16 sm:%s98_s18]   ;;  %v96_v22 = vsel %vm10_vm1, %v370_v19, %v91_v20  ;;  %109 = vrot.lane.b32.xlu1 %v372_v14, %s435_s4  ;;  %s145_s13 = smov 3  ;;  %s148_s14 = smov 12 }
   0xd   :  { %v101_v25 = vsel %vm14_vm2, %v371_v21, %v96_v22  ;;  %v375_v26 = vld [vmem:[%s748_s0 + $0x8] ss:$16 sm:%s118_s26]   ;;  %s153_s10 = smov 48  ;;  %s158_s16 = smov 192  ;;  %v380_v32 = vld [vmem:[%s748_s0 + $0x7] ss:$16 sm:%s145_s13]  }
   0xe   :  { %v121_v27 = vsel %vm6_vm0, %v375_v26, %v374_v24  ;;  %v376_v28 = vld [vmem:[%s748_s0 + $0x8] ss:$16 sm:%s123_s2]   ;;  %102 = vrot.lane.b32.xlu0 %v101_v25, %s435_s4  ;;  %s436_s21 = smov 80   ;;  %s175_s15 = smov 3 }
   0xf   :  { %v377_v29 = vld [vmem:[%s748_s0 + $0x8] ss:$16 sm:%s128_s3]   ;;  %v126_v30 = vsel %vm10_vm1, %v376_v28, %v121_v27  ;;  %v381_v33 = vld [vmem:[%s748_s0 + $0x7] ss:$16 sm:%s148_s14]   ;;  %s178_s24 = smov 12  ;;  %s183_s29 = smov 48 }
  0x10   :  { %v131_v31 = vsel %vm14_vm2, %v377_v29, %v126_v30  ;;  %139 = vrot.lane.b32.xlu1 %v378_v23, %s436_s21  ;;  %v151_v34 = vsel %vm6_vm0, %v381_v33, %v380_v32  ;;  %v382_v35 = vld [vmem:[%s748_s0 + $0x7] ss:$16 sm:%s153_s10]   ;;  %s188_s30 = smov 192  ;;  %s197_s2 = smov 3 }
  0x11   :  { %v384_v36 = vld [vmem:[%s748_s0 + $0x87] ss:$16 sm:%s167_s7]   ;;  %v156_v37 = vsel %vm10_vm1, %v382_v35, %v151_v34  ;;  %v386_v39 = vld [vmem:[%s748_s0 + $0x6] ss:$16 sm:%s175_s15]   ;;  %s205_s9 = smov 3  ;;  %s208_s11 = smov 12 }
  0x12   :  { %v383_v38 = vld [vmem:[%s748_s0 + $0x7] ss:$16 sm:%s158_s16]   ;;  %132 = vrot.lane.b32.xlu0 %v131_v31, %s436_s21  ;;  %s437_s12 = smov 70   ;;  %s227_s10 = smov 3 }
  0x13   :  { %v161_v40 = vsel %vm14_vm2, %v383_v38, %v156_v37  ;;  %v387_v41 = vld [vmem:[%s748_s0 + $0x6] ss:$16 sm:%s178_s24]   ;;  %s213_s16 = smov 48  ;;  %v392_v47 = vld [vmem:[%s748_s0 + $0x5] ss:$16 sm:%s205_s9]   ;;  %s218_s21 = smov 192 }
  0x14   :  { %v388_v42 = vld [vmem:[%s748_s0 + $0x6] ss:$16 sm:%s183_s29]   ;;  %169 = vrot.lane.b32.xlu1 %v384_v36, %s437_s12  ;;  %v181_v43 = vsel %vm6_vm0, %v387_v41, %v386_v39  ;;  %s235_s15 = smov 3  ;;  %s238_s24 = smov 12 }
  0x15   :  { %v389_v44 = vld [vmem:[%s748_s0 + $0x6] ss:$16 sm:%s188_s30]   ;;  %v186_v46 = vsel %vm10_vm1, %v388_v42, %v181_v43  ;;  %v393_v48 = vld [vmem:[%s748_s0 + $0x5] ss:$16 sm:%s208_s11]   ;;  %s243_s29 = smov 48  ;;  %s438_s30 = smov 60  }
  0x16   :  { %v390_v45 = vld [vmem:[%s748_s0 + $0x86] ss:$16 sm:%s197_s2]   ;;  %162 = vrot.lane.b32.xlu0 %v161_v40, %s437_s12  ;;  %v191_v49 = vsel %vm14_vm2, %v389_v44, %v186_v46  ;;  %v211_v51 = vsel %vm6_vm0, %v393_v48, %v392_v47  ;;  %s257_s4 = smov 3  ;;  %s248_s5 = smov 192 }
  0x17   :  { %v396_v50 = vld [vmem:[%s748_s0 + $0x85] ss:$16 sm:%s227_s10]   ;;  %v398_v55 = vld [vmem:[%s748_s0 + $0x4] ss:$16 sm:%s235_s15]   ;;  %s265_s11 = smov 3  ;;  %s268_s14 = smov 12 }
  0x18   :  { %v394_v52 = vld [vmem:[%s748_s0 + $0x5] ss:$16 sm:%s213_s16]   ;;  %199 = vrot.lane.b32.xlu1 %v390_v45, %s438_s30  ;;  %s273_s10 = smov 48  ;;  %s439_s20 = smov 50  }
  0x19   :  { %v216_v53 = vsel %vm10_vm1, %v394_v52, %v211_v51  ;;  %v395_v54 = vld [vmem:[%s748_s0 + $0x5] ss:$16 sm:%s218_s21]   ;;  %v399_v56 = vld [vmem:[%s748_s0 + $0x4] ss:$16 sm:%s238_s24]   ;;  %s278_s23 = smov 192  ;;  %s295_s15 = smov 3 }
  0x1a   :  { %192 = vrot.lane.b32.xlu0 %v191_v49, %s438_s30  ;;  %v241_v57 = vsel %vm6_vm0, %v399_v56, %v398_v55  ;;  %v400_v58 = vld [vmem:[%s748_s0 + $0x4] ss:$16 sm:%s243_s29]   ;;  %v221_v59 = vsel %vm14_vm2, %v395_v54, %v216_v53  ;;  %s298_s28 = smov 12  ;;  %s287_s29 = smov 3 }
  0x1b   :  { %v402_v60 = vld [vmem:[%s748_s0 + $0x84] ss:$16 sm:%s257_s4]   ;;  %v246_v62 = vsel %vm10_vm1, %v400_v58, %v241_v57  ;;  %v404_v63 = vld [vmem:[%s748_s0 + $0x3] ss:$16 sm:%s265_s11]   ;;  %s303_s30 = smov 48  ;;  %s317_s4 = smov 3 }
  0x1c   :  { %v401_v61 = vld [vmem:[%s748_s0 + $0x4] ss:$16 sm:%s248_s5]   ;;  %229 = vrot.lane.b32.xlu1 %v396_v50, %s439_s20  ;;  %s440_s7 = smov 40   ;;  %s325_s11 = smov 3 }
  0x1d   :  { %v405_v0 = vld [vmem:[%s748_s0 + $0x3] ss:$16 sm:%s268_s14]   ;;  %v251_v3 = vsel %vm14_vm2, %v401_v61, %v246_v62  ;;  %v410_v5 = vld [vmem:[%s748_s0 + $0x2] ss:$16 sm:%s295_s15]   ;;  %s328_s12 = smov 12  ;;  %s308_s17 = smov 192 }
  0x1e   :  { %v406_v1 = vld [vmem:[%s748_s0 + $0x3] ss:$16 sm:%s273_s10]   ;;  %222 = vrot.lane.b32.xlu0 %v221_v59, %s439_s20  ;;  %v271_v2 = vsel %vm6_vm0, %v405_v0, %v404_v63  ;;  %s333_s18 = smov 48  ;;  %s19_s19 = smov 3 }
  0x1f   :  { %v407_v4 = vld [vmem:[%s748_s0 + $0x3] ss:$16 sm:%s278_s23]   ;;  %v276_v6 = vsel %vm10_vm1, %v406_v1, %v271_v2  ;;  %v411_v7 = vld [vmem:[%s748_s0 + $0x2] ss:$16 sm:%s298_s28]   ;;  %s338_s25 = smov 192  ;;  %s2_s26 = smov 3 }
  0x20   :  { %259 = vrot.lane.b32.xlu1 %v402_v60, %s440_s7  ;;  %v408_v8 = vld [vmem:[%s748_s0 + $0x83] ss:$16 sm:%s287_s29]   ;;  %v301_v9 = vsel %vm6_vm0, %v411_v7, %v410_v5  ;;  %v281_v11 = vsel %vm14_vm2, %v407_v4, %v276_v6  ;;  %s441_s27 = smov 30   ;;  %s8_s2 = smov 48 }
  0x21   :  { %v412_v10 = vld [vmem:[%s748_s0 + $0x2] ss:$16 sm:%s303_s30]   ;;  %v416_v13 = vld [vmem:[%s748_s0 + $0x1] ss:$16 sm:%s325_s11]   ;;  %s4_s30 = smov 12  ;;  %s347_s8 = smov 3 }
  0x22   :  { %252 = vrot.lane.b32.xlu0 %v251_v3, %s440_s7  ;;  %v414_v12 = vld [vmem:[%s748_s0 + $0x82] ss:$16 sm:%s317_s4]   ;;  %v306_v15 = vsel %vm10_vm1, %v412_v10, %v301_v9  ;;  %s12_s7 = smov 192  ;;  %s442_s20 = smov 20  }
  0x23   :  { %v417_v14 = vld [vmem:[%s748_s0 + $0x1] ss:$16 sm:%s328_s12]   ;;  %v413_v16 = vld [vmem:[%s748_s0 + $0x2] ss:$16 sm:%s308_s17]  }
  0x24   :  { %289 = vrot.lane.b32.xlu1 %v408_v8, %s441_s27  ;;  %v331_v17 = vsel %vm6_vm0, %v417_v14, %v416_v13  ;;  %v418_v18 = vld [vmem:[%s748_s0 + $0x1] ss:$16 sm:%s333_s18]   ;;  %v311_v22 = vsel %vm14_vm2, %v413_v16, %v306_v15 }
  0x25   :  { %v354_v19 = vld [vmem:[%s748_s0 + $0x80] ss:$16 sm:%s19_s19]   ;;  %v419_v20 = vld [vmem:[%s748_s0 + $0x1] ss:$16 sm:%s338_s25]   ;;  %v336_v25 = vsel %vm10_vm1, %v418_v18, %v331_v17  ;;  %s443_s25 = smov 10  }
  0x26   :  { %282 = vrot.lane.b32.xlu0 %v281_v11, %s441_s27  ;;  %355 = vst.msk [vmem:[%s749_s1 + $0x8] sm:$0x3] %vm16_vm3, %v354_v19   ;;  %v3_v21 = vld [vmem:[%s748_s0] ss:$16 sm:%s2_s26]   ;;  %v341_v31 = vsel %vm14_vm2, %v419_v20, %v336_v25 }
  0x27   :  { %v5_v23 = vld [vmem:[%s748_s0] ss:$16 sm:%s4_s30]   ;;  %v420_v28 = vld [vmem:[%s748_s0 + $0x81] ss:$16 sm:%s347_s8]  }
  0x28   :  { %v9_v24 = vld [vmem:[%s748_s0] ss:$16 sm:%s8_s2]   ;;  %319 = vrot.lane.b32.xlu1 %v414_v12, %s442_s20  ;;  %v7_v26 = vsel %vm6_vm0, %v5_v23, %v3_v21 }
  0x29   :  { %v13_v27 = vld [vmem:[%s748_s0] ss:$16 sm:%s12_s7]   ;;  %v11_v29 = vsel %vm10_vm1, %v9_v24, %v7_v26 }
  0x2a   :  { %312 = vrot.lane.b32.xlu0 %v311_v22, %s442_s20  ;;  %v15_v30 = vsel %vm14_vm2, %v13_v27, %v11_v29 }
  0x2b   :  { %17 = vst.msk [vmem:[%s749_s1] sm:$0xff] %vm16_vm3, %v15_v30  }
  0x2c   :  { %349 = vrot.lane.b32.xlu1 %v420_v28, %s443_s25 }
  0x2e   :  { %342 = vrot.lane.b32.xlu0 %v341_v31, %s443_s25 }
  0x74   :  { %v80_v32 = vpop.permute.xlu1 %79  }
  0x75   :  { %v50_v33 = vpop.permute.xlu0 %49  }
  0x76   :  { %361 = vst.msk [vmem:[%s749_s1 + $0x8] sm:$0x3] %vm44_vm4, %v50_v33  }
  0x77   :  { %367 = vst.msk [vmem:[%s749_s1 + $0x8] sm:$0x3] %vm74_vm5, %v80_v32  }
  0x7a   :  { %v73_v34 = vpop.permute.xlu1 %72  }
  0x7c   :  { %v43_v35 = vpop.permute.xlu0 %42  }
  0x7d   :  { %45 = vst.msk [vmem:[%s749_s1] sm:$0xff] %vm44_vm4, %v43_v35  }
  0x7e   :  { %75 = vst.msk [vmem:[%s749_s1] sm:$0xff] %vm74_vm5, %v73_v34   ;;  %v110_v36 = vpop.permute.xlu1 %109  }
  0x7f   :  { %373 = vst.msk [vmem:[%s749_s1 + $0x8] sm:$0x3] %vm104_vm6, %v110_v36  }
  0x80   :  { %v103_v37 = vpop.permute.xlu0 %102  }
  0x81   :  { %105 = vst.msk [vmem:[%s749_s1] sm:$0xff] %vm104_vm6, %v103_v37  }
  0x82   :  { %v140_v38 = vpop.permute.xlu1 %139  }
  0x83   :  { %379 = vst.msk [vmem:[%s749_s1 + $0x8] sm:$0x3] %vm134_vm7, %v140_v38  }
  0x84   :  { %v133_v39 = vpop.permute.xlu0 %132  }
  0x85   :  { %135 = vst.msk [vmem:[%s749_s1] sm:$0xff] %vm134_vm7, %v133_v39  }
  0x86   :  { %v170_v40 = vpop.permute.xlu1 %169  }
  0x87   :  { %385 = vst.msk [vmem:[%s749_s1 + $0x8] sm:$0x3] %vm164_vm8, %v170_v40  }
  0x88   :  { %v163_v41 = vpop.permute.xlu0 %162  }
  0x89   :  { %165 = vst.msk [vmem:[%s749_s1] sm:$0xff] %vm164_vm8, %v163_v41  }
  0x8a   :  { %v200_v42 = vpop.permute.xlu1 %199  }
  0x8b   :  { %391 = vst.msk [vmem:[%s749_s1 + $0x8] sm:$0x3] %vm194_vm9, %v200_v42  }
  0x8c   :  { %v193_v43 = vpop.permute.xlu0 %192  }
  0x8d   :  { %195 = vst.msk [vmem:[%s749_s1] sm:$0xff] %vm194_vm9, %v193_v43  }
  0x8e   :  { %v230_v44 = vpop.permute.xlu1 %229  }
  0x8f   :  { %397 = vst.msk [vmem:[%s749_s1 + $0x8] sm:$0x3] %vm224_vm10, %v230_v44  }
  0x90   :  { %v223_v45 = vpop.permute.xlu0 %222  }
  0x91   :  { %225 = vst.msk [vmem:[%s749_s1] sm:$0xff] %vm224_vm10, %v223_v45  }
  0x92   :  { %v260_v46 = vpop.permute.xlu1 %259  }
  0x93   :  { %403 = vst.msk [vmem:[%s749_s1 + $0x8] sm:$0x3] %vm254_vm11, %v260_v46  }
  0x94   :  { %v253_v47 = vpop.permute.xlu0 %252  }
  0x95   :  { %255 = vst.msk [vmem:[%s749_s1] sm:$0xff] %vm254_vm11, %v253_v47  }
  0x96   :  { %v290_v48 = vpop.permute.xlu1 %289  }
  0x97   :  { %409 = vst.msk [vmem:[%s749_s1 + $0x8] sm:$0x3] %vm284_vm12, %v290_v48  }
  0x98   :  { %v283_v49 = vpop.permute.xlu0 %282  }
  0x99   :  { %285 = vst.msk [vmem:[%s749_s1] sm:$0xff] %vm284_vm12, %v283_v49  }
  0x9a   :  { %v320_v50 = vpop.permute.xlu1 %319  }
  0x9b   :  { %415 = vst.msk [vmem:[%s749_s1 + $0x8] sm:$0x3] %vm314_vm13, %v320_v50  }
  0x9c   :  { %v313_v51 = vpop.permute.xlu0 %312  }
  0x9d   :  { %315 = vst.msk [vmem:[%s749_s1] sm:$0xff] %vm314_vm13, %v313_v51  }
  0x9e   :  { %v350_v52 = vpop.permute.xlu1 %349  }
  0x9f   :  { %421 = vst.msk [vmem:[%s749_s1 + $0x8] sm:$0x3] %vm344_vm14, %v350_v52  }
  0xa0   :  { %v343_v53 = vpop.permute.xlu0 %342  }
  0xa1   :  { %345 = vst.msk [vmem:[%s749_s1] sm:$0xff] %vm344_vm14, %v343_v53  }

// kernel: lenet_forward.1
= control target key start
LH: loop header
LB: loop body
LE: loop exit
PB: predicated region body
PF: predicated region fallthrough
CT: control target
= control target key end

     0   :  { %v5165_v1 = vmov 0.0   ;;  %vm304_vm0 = vcmask 1040384   ;;  %vm3678_vm1 = vmmov 0   ;;  %v3679_v5 = vmov 0   ;;  %s5158_s0 = inlined_call_operand.vmem [shape: bf16[4,400,49], index: 0, kind: input, shape index: {}]   ;;  %s5159_s1 = inlined_call_operand.vmem [shape: bf16[49,120], index: 1, kind: input, shape index: {}]   ;;  %s5160_s2 = inlined_call_operand.vmem [shape: f32[1,120], index: 2, kind: input, shape index: {}]   ;;  %s5161_s3 = inlined_call_operand.vmem [shape: f32[200,120], index: 3, kind: input, shape index: {}]   ;;  %s5162_s4 = inlined_call_operand.vmem [shape: f32[120,10], index: 4, kind: input, shape index: {}]   ;;  %s5163_s5 = inlined_call_operand.vmem [shape: f32[1,10], index: 5, kind: input, shape index: {}]   ;;  %s5164_s6 = inlined_call_operand.hbm [shape: f32[2,10], index: 6, kind: output, shape index: {}]  }
   0x1   :  { %v3544_v0 = vld [vmem:[%s5159_s1] sm:$0xff]   ;;  %3053 = vmatprep.subr.bf16.mxu0 %v5165_v1  ;;  %3161 = vmatprep.subr.bf16.mxu1 %v5165_v1  ;;  %v3545_v2 = vld [vmem:[%s5159_s1 + $0x8] sm:$0xff]   ;;  %v3547_v3 = vld [vmem:[%s5159_s1 + $0x18] ss:$0 sps:$4 sm:$0x11]   ;;  %v306_v6 = vsel %vm304_vm0, 65535, %v3679_v5 }
   0x2   :  { %3054 = vmatpush3.bf16.msra.mxu0 %v3544_v0  ;;  %3162 = vmatpush3.bf16.msra.mxu1 %v3544_v0  ;;  %v3546_v4 = vld [vmem:[%s5159_s1 + $0x10] sm:$0xff]   ;;  %v308_v7 = vand.u32 %v3547_v3, %v306_v6  ;;  %v3548_v8 = vld [vmem:[%s5158_s0] sm:$0xff]   ;;  %v3549_v9 = vld [vmem:[%s5158_s0 + $0xc8] sm:$0xff]   ;;  %vm228_vm2 = vcmask 400384  }
   0x3   :  { %3055 = vmatprep.subr.bf16.mxu0 %v5165_v1  ;;  %3163 = vmatprep.subr.bf16.mxu1 %v5165_v1  ;;  %v3550_v10 = vld [vmem:[%s5158_s0 + $0x8] sm:$0xff]   ;;  %v3551_v11 = vld [vmem:[%s5158_s0 + $0xd0] sm:$0xff]   ;;  %v3553_v13 = vld [vmem:[%s5158_s0 + $0xd8] sm:$0xff]  }
   0x4   :  { %3061 = vmatprep.mubr.msk.bf16.mxu0 %vm3678_vm1, %v5165_v1  ;;  %3169 = vmatprep.mubr.msk.bf16.mxu1 %vm3678_vm1, %v5165_v1  ;;  %v3552_v12 = vld [vmem:[%s5158_s0 + $0x10] sm:$0xff]   ;;  %v3554_v14 = vld [vmem:[%s5158_s0 + $0x18] sm:$0xff]   ;;  %v3555_v15 = vld [vmem:[%s5158_s0 + $0xe0] sm:$0xff]  }
   0x5   :  { %v3556_v16 = vld [vmem:[%s5158_s0 + $0x20] sm:$0xff]   ;;  %v3557_v17 = vld [vmem:[%s5158_s0 + $0xe8] sm:$0xff]   ;;  %v3559_v19 = vld [vmem:[%s5158_s0 + $0xf0] sm:$0xff]  }
   0x6   :  { %3056 = vmatpush3.bf16.msra.mxu0 %v3545_v2  ;;  %3164 = vmatpush3.bf16.msra.mxu1 %v3545_v2  ;;  %v3558_v18 = vld [vmem:[%s5158_s0 + $0x28] sm:$0xff]   ;;  %v3560_v20 = vld [vmem:[%s5158_s0 + $0x30] sm:$0xff]   ;;  %v3561_v21 = vld [vmem:[%s5158_s0 + $0xf8] sm:$0xff]  }
   0x7   :  { %3057 = vmatprep.subr.bf16.mxu0 %v5165_v1  ;;  %3165 = vmatprep.subr.bf16.mxu1 %v5165_v1  ;;  %v3562_v22 = vld [vmem:[%s5158_s0 + $0x38] sm:$0xff]   ;;  %v3563_v23 = vld [vmem:[%s5158_s0 + $0x100] sm:$0xff]   ;;  %v3565_v25 = vld [vmem:[%s5158_s0 + $0x108] sm:$0xff]  }
   0x8   :  { %v3564_v24 = vld [vmem:[%s5158_s0 + $0x40] sm:$0xff]   ;;  %v3566_v26 = vld [vmem:[%s5158_s0 + $0x48] sm:$0xff]   ;;  %v3567_v27 = vld [vmem:[%s5158_s0 + $0x110] sm:$0xff]  }
   0xa   :  { %3058 = vmatpush3.bf16.msra.mxu0 %v3546_v4  ;;  %3166 = vmatpush3.bf16.msra.mxu1 %v3546_v4 }
   0xb   :  { %3059 = vmatprep.subr.bf16.mxu0 %v5165_v1  ;;  %3167 = vmatprep.subr.bf16.mxu1 %v5165_v1 }
   0xe   :  { %3060 = vmatpush3.bf16.msra.mxu0 %v308_v7  ;;  %3168 = vmatpush3.bf16.msra.mxu1 %v308_v7 }
   0xf   :  { %3269 = vmatprep.subr.bf16.mxu0 %v5165_v1  ;;  %3377 = vmatprep.subr.bf16.mxu1 %v5165_v1 }
  0x11   :  { %3062 = vmatmul.mubr.msk.bf16.vlgmr.msra.gmra.mrb[0].mxu0 %vm228_vm2, %v3548_v8  ;;  %3170 = vmatmul.mubr.msk.bf16.vlgmr.msra.gmra.mrb[0].mxu1 %vm228_vm2, %v3549_v9 }
  0x12   :  { %3270 = vmatpush3.bf16.msra.mxu0 %v3544_v0  ;;  %3378 = vmatpush3.bf16.msra.mxu1 %v3544_v0 }
  0x13   :  { %3065 = vmatprep.mubr.msk.bf16.mxu0 %vm3678_vm1, %v5165_v1  ;;  %3173 = vmatprep.mubr.msk.bf16.mxu1 %vm3678_vm1, %v5165_v1 }
  0x14   :  { %3271 = vmatprep.subr.bf16.mxu0 %v5165_v1  ;;  %3379 = vmatprep.subr.bf16.mxu1 %v5165_v1 }
  0x16   :  { %3272 = vmatpush3.bf16.msra.mxu0 %v3545_v2  ;;  %3380 = vmatpush3.bf16.msra.mxu1 %v3545_v2 }
  0x17   :  { %3273 = vmatprep.subr.bf16.mxu0 %v5165_v1  ;;  %3381 = vmatprep.subr.bf16.mxu1 %v5165_v1 }
  0x19   :  { %3066 = vmatmul.mubr.msk.bf16.gmra.mrb[4].mxu0 %vm228_vm2, %v3550_v10  ;;  %3174 = vmatmul.mubr.msk.bf16.gmra.mrb[4].mxu1 %vm228_vm2, %v3551_v11 }
  0x1a   :  { %3069 = vmatprep.mubr.msk.bf16.mxu0 %vm3678_vm1, %v5165_v1  ;;  %3177 = vmatprep.mubr.msk.bf16.mxu1 %vm3678_vm1, %v5165_v1 }
  0x1b   :  { %3274 = vmatpush3.bf16.msra.mxu0 %v3546_v4  ;;  %3382 = vmatpush3.bf16.msra.mxu1 %v3546_v4 }
  0x1c   :  { %3275 = vmatprep.subr.bf16.mxu0 %v5165_v1  ;;  %3383 = vmatprep.subr.bf16.mxu1 %v5165_v1 }
  0x1f   :  { %3276 = vmatpush3.bf16.msra.mxu0 %v308_v7  ;;  %3384 = vmatpush3.bf16.msra.mxu1 %v308_v7 }
  0x21   :  { %3070 = vmatmul.mubr.msk.bf16.gmra.mrb[8].mxu0 %vm228_vm2, %v3552_v12  ;;  %3178 = vmatmul.mubr.msk.bf16.gmra.mrb[8].mxu1 %vm228_vm2, %v3553_v13 }
  0x22   :  { %3073 = vmatprep.mubr.msk.bf16.mxu0 %vm3678_vm1, %v5165_v1  ;;  %3181 = vmatprep.mubr.msk.bf16.mxu1 %vm3678_vm1, %v5165_v1 }
  0x29   :  { %3074 = vmatmul.mubr.msk.bf16.gmra.mrb[12].mxu0 %vm228_vm2, %v3554_v14  ;;  %3182 = vmatmul.mubr.msk.bf16.gmra.mrb[12].mxu1 %vm228_vm2, %v3555_v15 }
  0x2a   :  { %3077 = vmatprep.mubr.msk.bf16.mxu0 %vm3678_vm1, %v5165_v1  ;;  %3185 = vmatprep.mubr.msk.bf16.mxu1 %vm3678_vm1, %v5165_v1 }
  0x31   :  { %3078 = vmatmul.mubr.msk.bf16.gmra.mrb[16].mxu0 %vm228_vm2, %v3556_v16  ;;  %3186 = vmatmul.mubr.msk.bf16.gmra.mrb[16].mxu1 %vm228_vm2, %v3557_v17 }
  0x32   :  { %3081 = vmatprep.mubr.msk.bf16.mxu0 %vm3678_vm1, %v5165_v1  ;;  %3189 = vmatprep.mubr.msk.bf16.mxu1 %vm3678_vm1, %v5165_v1 }
  0x39   :  { %3082 = vmatmul.mubr.msk.bf16.gmra.mrb[20].mxu0 %vm228_vm2, %v3558_v18  ;;  %3190 = vmatmul.mubr.msk.bf16.gmra.mrb[20].mxu1 %vm228_vm2, %v3559_v19 }
  0x3a   :  { %3085 = vmatprep.mubr.msk.bf16.mxu0 %vm3678_vm1, %v5165_v1  ;;  %3193 = vmatprep.mubr.msk.bf16.mxu1 %vm3678_vm1, %v5165_v1 }
  0x41   :  { %3086 = vmatmul.mubr.msk.bf16.gmra.mrb[24].mxu0 %vm228_vm2, %v3560_v20  ;;  %3194 = vmatmul.mubr.msk.bf16.gmra.mrb[24].mxu1 %vm228_vm2, %v3561_v21 }
  0x42   :  { %3089 = vmatprep.mubr.msk.bf16.mxu0 %vm3678_vm1, %v5165_v1  ;;  %3197 = vmatprep.mubr.msk.bf16.mxu1 %vm3678_vm1, %v5165_v1 }
  0x49   :  { %3090 = vmatmul.mubr.msk.bf16.gmra.mrb[28].mxu0 %vm228_vm2, %v3562_v22  ;;  %3198 = vmatmul.mubr.msk.bf16.gmra.mrb[28].mxu1 %vm228_vm2, %v3563_v23 }
  0x4a   :  { %3093 = vmatprep.mubr.msk.bf16.mxu0 %vm3678_vm1, %v5165_v1  ;;  %3201 = vmatprep.mubr.msk.bf16.mxu1 %vm3678_vm1, %v5165_v1 }
  0x51   :  { %3094 = vmatmul.mubr.msk.bf16.gmra.mrb[32].mxu0 %vm228_vm2, %v3564_v24  ;;  %3202 = vmatmul.mubr.msk.bf16.gmra.mrb[32].mxu1 %vm228_vm2, %v3565_v25 }
  0x52   :  { %3097 = vmatprep.mubr.msk.bf16.mxu0 %vm3678_vm1, %v5165_v1  ;;  %3205 = vmatprep.mubr.msk.bf16.mxu1 %vm3678_vm1, %v5165_v1 }
  0x53   :  { %11 = vsyncpa [#allocation3], 0  ;;  %v3568_v28 = vld [vmem:[%s5158_s0 + $0x50] sm:$0xff]   ;;  %v3569_v29 = vld [vmem:[%s5158_s0 + $0x118] sm:$0xff]   ;;  %vm2327_vm3 = vcmask 982016   ;;  %vm2462_vm4 = vcmask 1041409  }
  0x54   :  { %v3570_v30 = vld [vmem:[%s5158_s0 + $0x58] sm:$0xff]   ;;  %v3571_v31 = vld [vmem:[%s5158_s0 + $0x120] sm:$0xff]   ;;  %v3573_v33 = vld [vmem:[%s5158_s0 + $0x128] sm:$0xff]   ;;  %vm2536_vm5 = vcmask 74752   ;;  %s3681_s9 = smov [#allocation2]  }
  0x55   :  { %v3572_v32 = vld [vmem:[%s5158_s0 + $0x60] sm:$0xff]   ;;  %v3574_v34 = vld [vmem:[%s5158_s0 + $0x68] sm:$0xff]   ;;  %v3575_v35 = vld [vmem:[%s5158_s0 + $0x130] sm:$0xff]  }
  0x56   :  { %v3576_v36 = vld [vmem:[%s5158_s0 + $0x70] sm:$0xff]   ;;  %v3577_v37 = vld [vmem:[%s5158_s0 + $0x138] sm:$0xff]   ;;  %v3579_v39 = vld [vmem:[%s5158_s0 + $0x140] sm:$0xff]  }
  0x57   :  { %v3578_v38 = vld [vmem:[%s5158_s0 + $0x78] sm:$0xff]   ;;  %v3580_v40 = vld [vmem:[%s5158_s0 + $0x80] sm:$0xff]   ;;  %v3581_v41 = vld [vmem:[%s5158_s0 + $0x148] sm:$0xff]  }
  0x58   :  { %v3582_v42 = vld [vmem:[%s5158_s0 + $0x88] sm:$0xff]   ;;  %v3583_v43 = vld [vmem:[%s5158_s0 + $0x150] sm:$0xff]   ;;  %v3585_v45 = vld [vmem:[%s5158_s0 + $0x158] sm:$0xff]  }
  0x59   :  { %3098 = vmatmul.mubr.msk.bf16.gmra.mrb[36].mxu0 %vm228_vm2, %v3566_v26  ;;  %3206 = vmatmul.mubr.msk.bf16.gmra.mrb[36].mxu1 %vm228_vm2, %v3567_v27  ;;  %v3584_v44 = vld [vmem:[%s5158_s0 + $0x90] sm:$0xff]   ;;  %v3586_v46 = vld [vmem:[%s5158_s0 + $0x98] sm:$0xff]   ;;  %v3587_v47 = vld [vmem:[%s5158_s0 + $0x160] sm:$0xff]  }
  0x5a   :  { %3101 = vmatprep.mubr.msk.bf16.mxu0 %vm3678_vm1, %v5165_v1  ;;  %3209 = vmatprep.mubr.msk.bf16.mxu1 %vm3678_vm1, %v5165_v1  ;;  %v3588_v48 = vld [vmem:[%s5158_s0 + $0xa0] sm:$0xff]   ;;  %v3589_v49 = vld [vmem:[%s5158_s0 + $0x168] sm:$0xff]   ;;  %v3591_v51 = vld [vmem:[%s5158_s0 + $0x170] sm:$0xff]  }
  0x5b   :  { %v3590_v50 = vld [vmem:[%s5158_s0 + $0xa8] sm:$0xff]   ;;  %v3592_v52 = vld [vmem:[%s5158_s0 + $0xb0] sm:$0xff]   ;;  %v3593_v53 = vld [vmem:[%s5158_s0 + $0x178] sm:$0xff]  }
  0x5c   :  { %v3594_v54 = vld [vmem:[%s5158_s0 + $0xb8] sm:$0xff]   ;;  %v3595_v55 = vld [vmem:[%s5158_s0 + $0x180] sm:$0xff]   ;;  %v3597_v57 = vld [vmem:[%s5158_s0 + $0x188] sm:$0xff]  }
  0x5d   :  { %v3596_v56 = vld [vmem:[%s5158_s0 + $0xc0] sm:$0xff]   ;;  %v3598_v58 = vld [vmem:[%s5158_s0 + $0x190] sm:$0xff]   ;;  %v3599_v59 = vld [vmem:[%s5158_s0 + $0x258] sm:$0xff]  }
  0x5e   :  { %v3600_v60 = vld [vmem:[%s5158_s0 + $0x198] sm:$0xff]   ;;  %v3601_v61 = vld [vmem:[%s5158_s0 + $0x260] sm:$0xff]   ;;  %v3603_v5 = vld [vmem:[%s5158_s0 + $0x268] sm:$0xff]  }
  0x5f   :  { %v3602_v4 = vld [vmem:[%s5158_s0 + $0x1a0] sm:$0xff]   ;;  %v3604_v16 = vld [vmem:[%s5158_s0 + $0x1a8] sm:$0xff]   ;;  %v3605_v17 = vld [vmem:[%s5158_s0 + $0x270] sm:$0xff]  }
  0x60   :  { %v3628_v8 = vld [vmem:[%s5158_s0 + $0x208] sm:$0xff]   ;;  %v3629_v0 = vld [vmem:[%s5158_s0 + $0x2d0] sm:$0xff]  }
  0x61   :  { %3102 = vmatmul.mubr.msk.bf16.gmra.mrb[40].mxu0 %vm228_vm2, %v3568_v28  ;;  %3210 = vmatmul.mubr.msk.bf16.gmra.mrb[40].mxu1 %vm228_vm2, %v3569_v29  ;;  %v3606_v28 = vld [vmem:[%s5158_s0 + $0x1b0] sm:$0xff]   ;;  %v3607_v29 = vld [vmem:[%s5158_s0 + $0x278] sm:$0xff]  }
  0x62   :  { %3105 = vmatprep.mubr.msk.bf16.mxu0 %vm3678_vm1, %v5165_v1  ;;  %3213 = vmatprep.mubr.msk.bf16.mxu1 %vm3678_vm1, %v5165_v1 }
  0x69   :  { %3106 = vmatmul.mubr.msk.bf16.gmra.mrb[44].mxu0 %vm228_vm2, %v3570_v30  ;;  %3214 = vmatmul.mubr.msk.bf16.gmra.mrb[44].mxu1 %vm228_vm2, %v3571_v31 }
  0x6a   :  { %3109 = vmatprep.mubr.msk.bf16.mxu0 %vm3678_vm1, %v5165_v1  ;;  %3217 = vmatprep.mubr.msk.bf16.mxu1 %vm3678_vm1, %v5165_v1 }
  0x71   :  { %3110 = vmatmul.mubr.msk.bf16.gmra.mrb[48].mxu0 %vm228_vm2, %v3572_v32  ;;  %3218 = vmatmul.mubr.msk.bf16.gmra.mrb[48].mxu1 %vm228_vm2, %v3573_v33  ;;  %v5233_v32 = vmov 0.0  }
  0x72   :  { %3113 = vmatprep.mubr.msk.bf16.mxu0 %vm3678_vm1, %v5165_v1  ;;  %3221 = vmatprep.mubr.msk.bf16.mxu1 %vm3678_vm1, %v5165_v1 }
  0x79   :  { %3114 = vmatmul.mubr.msk.bf16.gmra.mrb[52].mxu0 %vm228_vm2, %v3574_v34  ;;  %3222 = vmatmul.mubr.msk.bf16.gmra.mrb[52].mxu1 %vm228_vm2, %v3575_v35 }
  0x7a   :  { %3117 = vmatprep.mubr.msk.bf16.mxu0 %vm3678_vm1, %v5165_v1  ;;  %3225 = vmatprep.mubr.msk.bf16.mxu1 %vm3678_vm1, %v5165_v1 }
  0x81   :  { %3118 = vmatmul.mubr.msk.bf16.gmra.mrb[56].mxu0 %vm228_vm2, %v3576_v36  ;;  %3226 = vmatmul.mubr.msk.bf16.gmra.mrb[56].mxu1 %vm228_vm2, %v3577_v37 }
  0x82   :  { %3121 = vmatprep.mubr.msk.bf16.mxu0 %vm3678_vm1, %v5165_v1  ;;  %3229 = vmatprep.mubr.msk.bf16.mxu1 %vm3678_vm1, %v5165_v1 }
  0x89   :  { %3122 = vmatmul.mubr.msk.bf16.gmra.mrb[60].mxu0 %vm228_vm2, %v3578_v38  ;;  %3230 = vmatmul.mubr.msk.bf16.gmra.mrb[60].mxu1 %vm228_vm2, %v3579_v39 }
  0x8a   :  { %3125 = vmatprep.mubr.msk.bf16.mxu0 %vm3678_vm1, %v5165_v1  ;;  %3233 = vmatprep.mubr.msk.bf16.mxu1 %vm3678_vm1, %v5165_v1 }
  0x91   :  { %3126 = vmatmul.mubr.msk.bf16.gmra.mrb[64].mxu0 %vm228_vm2, %v3580_v40  ;;  %3234 = vmatmul.mubr.msk.bf16.gmra.mrb[64].mxu1 %vm228_vm2, %v3581_v41  ;;  %v3608_v40 = vld [vmem:[%s5158_s0 + $0x1b8] sm:$0xff]   ;;  %v3609_v41 = vld [vmem:[%s5158_s0 + $0x280] sm:$0xff]  }
  0x92   :  { %3129 = vmatprep.mubr.msk.bf16.mxu0 %vm3678_vm1, %v5165_v1  ;;  %3237 = vmatprep.mubr.msk.bf16.mxu1 %vm3678_vm1, %v5165_v1 }
  0x99   :  { %3130 = vmatmul.mubr.msk.bf16.gmra.mrb[68].mxu0 %vm228_vm2, %v3582_v42  ;;  %3238 = vmatmul.mubr.msk.bf16.gmra.mrb[68].mxu1 %vm228_vm2, %v3583_v43 }
  0x9a   :  { %3133 = vmatprep.mubr.msk.bf16.mxu0 %vm3678_vm1, %v5165_v1  ;;  %3241 = vmatprep.mubr.msk.bf16.mxu1 %vm3678_vm1, %v5165_v1 }
  0xa1   :  { %3134 = vmatmul.mubr.msk.bf16.gmra.mrb[72].mxu0 %vm228_vm2, %v3584_v44  ;;  %3242 = vmatmul.mubr.msk.bf16.gmra.mrb[72].mxu1 %vm228_vm2, %v3585_v45 }
  0xa2   :  { %3137 = vmatprep.mubr.msk.bf16.mxu0 %vm3678_vm1, %v5165_v1  ;;  %3245 = vmatprep.mubr.msk.bf16.mxu1 %vm3678_vm1, %v5165_v1 }
  0xa9   :  { %3138 = vmatmul.mubr.msk.bf16.gmra.mrb[76].mxu0 %vm228_vm2, %v3586_v46  ;;  %3246 = vmatmul.mubr.msk.bf16.gmra.mrb[76].mxu1 %vm228_vm2, %v3587_v47 }
  0xaa   :  { %3141 = vmatprep.mubr.msk.bf16.mxu0 %vm3678_vm1, %v5165_v1  ;;  %3249 = vmatprep.mubr.msk.bf16.mxu1 %vm3678_vm1, %v5165_v1 }
  0xb1   :  { %3142 = vmatmul.mubr.msk.bf16.gmra.mrb[80].mxu0 %vm228_vm2, %v3588_v48  ;;  %3250 = vmatmul.mubr.msk.bf16.gmra.mrb[80].mxu1 %vm228_vm2, %v3589_v49 }
  0xb2   :  { %3145 = vmatprep.mubr.msk.bf16.mxu0 %vm3678_vm1, %v5165_v1  ;;  %3253 = vmatprep.mubr.msk.bf16.mxu1 %vm3678_vm1, %v5165_v1 }
  0xb9   :  { %3146 = vmatmul.mubr.msk.bf16.gmra.mrb[84].mxu0 %vm228_vm2, %v3590_v50  ;;  %3254 = vmatmul.mubr.msk.bf16.gmra.mrb[84].mxu1 %vm228_vm2, %v3591_v51 }
  0xba   :  { %3149 = vmatprep.mubr.msk.bf16.mxu0 %vm3678_vm1, %v5165_v1  ;;  %3257 = vmatprep.mubr.msk.bf16.mxu1 %vm3678_vm1, %v5165_v1 }
  0xc1   :  { %3150 = vmatmul.mubr.msk.bf16.gmra.mrb[88].mxu0 %vm228_vm2, %v3592_v52  ;;  %3258 = vmatmul.mubr.msk.bf16.gmra.mrb[88].mxu1 %vm228_vm2, %v3593_v53  ;;  %v3610_v52 = vld [vmem:[%s5158_s0 + $0x1c0] sm:$0xff]   ;;  %v3611_v53 = vld [vmem:[%s5158_s0 + $0x288] sm:$0xff]  }
  0xc2   :  { %3153 = vmatprep.mubr.msk.bf16.mxu0 %vm3678_vm1, %v5165_v1  ;;  %3261 = vmatprep.mubr.msk.bf16.mxu1 %vm3678_vm1, %v5165_v1 }
  0xc9   :  { %3154 = vmatmul.mubr.msk.bf16.gmra.mrb[92].mxu0 %vm228_vm2, %v3594_v54  ;;  %3262 = vmatmul.mubr.msk.bf16.gmra.mrb[92].mxu1 %vm228_vm2, %v3595_v55 }
  0xca   :  { %3157 = vmatprep.mubr.msk.bf16.mxu0 %vm3678_vm1, %v5165_v1  ;;  %3265 = vmatprep.mubr.msk.bf16.mxu1 %vm3678_vm1, %v5165_v1 }
  0xd1   :  { %3158 = vmatmul.mubr.msk.bf16.gmra.mrb[96].mxu0 %vm228_vm2, %v3596_v56  ;;  %3266 = vmatmul.mubr.msk.bf16.gmra.mrb[96].mxu1 %vm228_vm2, %v3597_v57 }
  0xd2   :  { %3277 = vmatprep.mubr.msk.bf16.mxu0 %vm3678_vm1, %v5165_v1  ;;  %3385 = vmatprep.mubr.msk.bf16.mxu1 %vm3678_vm1, %v5165_v1 }
  0xd9   :  { %3278 = vmatmul.mubr.msk.bf16.vlgmr.msra.gmra.mrb[100].mxu0 %vm228_vm2, %v3598_v58  ;;  %3386 = vmatmul.mubr.msk.bf16.vlgmr.msra.gmra.mrb[100].mxu1 %vm228_vm2, %v3599_v59 }
  0xda   :  { %3281 = vmatprep.mubr.msk.bf16.mxu0 %vm3678_vm1, %v5165_v1  ;;  %3389 = vmatprep.mubr.msk.bf16.mxu1 %vm3678_vm1, %v5165_v1 }
  0xe1   :  { %3282 = vmatmul.mubr.msk.bf16.gmra.mrb[104].mxu0 %vm228_vm2, %v3600_v60  ;;  %3390 = vmatmul.mubr.msk.bf16.gmra.mrb[104].mxu1 %vm228_vm2, %v3601_v61 }
  0xe2   :  { %3285 = vmatprep.mubr.msk.bf16.mxu0 %vm3678_vm1, %v5165_v1  ;;  %3393 = vmatprep.mubr.msk.bf16.mxu1 %vm3678_vm1, %v5165_v1 }
  0xe4   :  { %v4073_v62 = vpop.f32.mrb[0].mxu0  ;;  %v4075_v63 = vpop.f32.mrb[0].mxu1 }
  0xe5   :  { %v3063_v2 = vpop.f32.mrb[1].mxu0  ;;  %v3171_v3 = vpop.f32.mrb[1].mxu1 }
  0xe6   :  { %v4085_v6 = vpop.f32.mrb[2].mxu0  ;;  %v4087_v7 = vpop.f32.mrb[2].mxu1 }
  0xe7   :  { %v3064_v9 = vpop.f32.mrb[3].mxu0  ;;  %v3172_v10 = vpop.f32.mrb[3].mxu1 }
  0xe9   :  { %3286 = vmatmul.mubr.msk.bf16.gmra.mrb[108].mxu0 %vm228_vm2, %v3602_v4  ;;  %3394 = vmatmul.mubr.msk.bf16.gmra.mrb[108].mxu1 %vm228_vm2, %v3603_v5  ;;  %v3612_v4 = vld [vmem:[%s5158_s0 + $0x1c8] sm:$0xff]   ;;  %v3613_v5 = vld [vmem:[%s5158_s0 + $0x290] sm:$0xff]  }
  0xea   :  { %3289 = vmatprep.mubr.msk.bf16.mxu0 %vm3678_vm1, %v5165_v1  ;;  %3397 = vmatprep.mubr.msk.bf16.mxu1 %vm3678_vm1, %v5165_v1 }
  0xec   :  { %v4097_v11 = vpop.f32.mrb[4].mxu0  ;;  %v4099_v12 = vpop.f32.mrb[4].mxu1 }
  0xed   :  { %v3067_v14 = vpop.f32.mrb[5].mxu0  ;;  %v3175_v15 = vpop.f32.mrb[5].mxu1 }
  0xee   :  { %v4109_v18 = vpop.f32.mrb[6].mxu0  ;;  %v4111_v19 = vpop.f32.mrb[6].mxu1 }
  0xef   :  { %v3068_v21 = vpop.f32.mrb[7].mxu0  ;;  %v3176_v22 = vpop.f32.mrb[7].mxu1 }
  0xf1   :  { %3290 = vmatmul.mubr.msk.bf16.gmra.mrb[112].mxu0 %vm228_vm2, %v3604_v16  ;;  %3398 = vmatmul.mubr.msk.bf16.gmra.mrb[112].mxu1 %vm228_vm2, %v3605_v17 }
  0xf2   :  { %3293 = vmatprep.mubr.msk.bf16.mxu0 %vm3678_vm1, %v5165_v1  ;;  %3401 = vmatprep.mubr.msk.bf16.mxu1 %vm3678_vm1, %v5165_v1 }
  0xf4   :  { %v4121_v23 = vpop.f32.mrb[8].mxu0  ;;  %v4123_v24 = vpop.f32.mrb[8].mxu1 }
  0xf5   :  { %v3071_v26 = vpop.f32.mrb[9].mxu0  ;;  %v3179_v27 = vpop.f32.mrb[9].mxu1 }
  0xf6   :  { %v4133_v30 = vpop.f32.mrb[10].mxu0  ;;  %v4135_v31 = vpop.f32.mrb[10].mxu1 }
  0xf7   :  { %v3072_v33 = vpop.f32.mrb[11].mxu0  ;;  %v3180_v34 = vpop.f32.mrb[11].mxu1 }
  0xf9   :  { %3294 = vmatmul.mubr.msk.bf16.gmra.mrb[116].mxu0 %vm228_vm2, %v3606_v28  ;;  %3402 = vmatmul.mubr.msk.bf16.gmra.mrb[116].mxu1 %vm228_vm2, %v3607_v29  ;;  %v3614_v28 = vld [vmem:[%s5158_s0 + $0x1d0] sm:$0xff]   ;;  %v3615_v29 = vld [vmem:[%s5158_s0 + $0x298] sm:$0xff]  }
  0xfa   :  { %3297 = vmatprep.mubr.msk.bf16.mxu0 %vm3678_vm1, %v5165_v1  ;;  %3405 = vmatprep.mubr.msk.bf16.mxu1 %vm3678_vm1, %v5165_v1 }
  0xfc   :  { %v4145_v35 = vpop.f32.mrb[12].mxu0  ;;  %v4147_v36 = vpop.f32.mrb[12].mxu1 }
  0xfd   :  { %v3075_v38 = vpop.f32.mrb[13].mxu0  ;;  %v3183_v39 = vpop.f32.mrb[13].mxu1 }
  0xfe   :  { %v4157_v42 = vpop.f32.mrb[14].mxu0  ;;  %v4159_v43 = vpop.f32.mrb[14].mxu1 }
  0xff   :  { %v3076_v45 = vpop.f32.mrb[15].mxu0  ;;  %v3184_v46 = vpop.f32.mrb[15].mxu1 }
 0x101   :  { %3298 = vmatmul.mubr.msk.bf16.gmra.mrb[120].mxu0 %vm228_vm2, %v3608_v40  ;;  %3406 = vmatmul.mubr.msk.bf16.gmra.mrb[120].mxu1 %vm228_vm2, %v3609_v41 }
 0x102   :  { %3301 = vmatprep.mubr.msk.bf16.mxu0 %vm3678_vm1, %v5165_v1  ;;  %3409 = vmatprep.mubr.msk.bf16.mxu1 %vm3678_vm1, %v5165_v1 }
 0x104   :  { %v4169_v47 = vpop.f32.mrb[16].mxu0  ;;  %v4171_v48 = vpop.f32.mrb[16].mxu1 }
 0x105   :  { %v3079_v50 = vpop.f32.mrb[17].mxu0  ;;  %v3187_v51 = vpop.f32.mrb[17].mxu1 }
 0x106   :  { %v4181_v54 = vpop.f32.mrb[18].mxu0  ;;  %v4183_v55 = vpop.f32.mrb[18].mxu1 }
 0x107   :  { %v3080_v57 = vpop.f32.mrb[19].mxu0  ;;  %v3188_v58 = vpop.f32.mrb[19].mxu1 }
 0x109   :  { %3302 = vmatmul.mubr.msk.bf16.gmra.mrb[124].mxu0 %vm228_vm2, %v3610_v52  ;;  %3410 = vmatmul.mubr.msk.bf16.gmra.mrb[124].mxu1 %vm228_vm2, %v3611_v53  ;;  %v3616_v52 = vld [vmem:[%s5158_s0 + $0x1d8] sm:$0xff]   ;;  %v3617_v53 = vld [vmem:[%s5158_s0 + $0x2a0] sm:$0xff]  }
 0x10a   :  { %3305 = vmatprep.mubr.msk.bf16.mxu0 %vm3678_vm1, %v5165_v1  ;;  %3413 = vmatprep.mubr.msk.bf16.mxu1 %vm3678_vm1, %v5165_v1 }
 0x10c   :  { %v4193_v59 = vpop.f32.mrb[20].mxu0  ;;  %v4195_v60 = vpop.f32.mrb[20].mxu1 }
 0x10d   :  { %v3083_v2 = vpop.f32.mrb[21].mxu0  ;;  %v3191_v3 = vpop.f32.mrb[21].mxu1 }
 0x10e   :  { %v4205_v9 = vpop.f32.mrb[22].mxu0  ;;  %v4207_v10 = vpop.f32.mrb[22].mxu1 }
 0x10f   :  { %v3084_v15 = vpop.f32.mrb[23].mxu0  ;;  %v3192_v16 = vpop.f32.mrb[23].mxu1 }
 0x111   :  { %3306 = vmatmul.mubr.msk.bf16.gmra.mrb[128].mxu0 %vm228_vm2, %v3612_v4  ;;  %3414 = vmatmul.mubr.msk.bf16.gmra.mrb[128].mxu1 %vm228_vm2, %v3613_v5 }
 0x112   :  { %3309 = vmatprep.mubr.msk.bf16.mxu0 %vm3678_vm1, %v5165_v1  ;;  %3417 = vmatprep.mubr.msk.bf16.mxu1 %vm3678_vm1, %v5165_v1 }
 0x114   :  { %v4217_v17 = vpop.f32.mrb[24].mxu0  ;;  %v4219_v21 = vpop.f32.mrb[24].mxu1 }
 0x115   :  { %v3087_v26 = vpop.f32.mrb[25].mxu0  ;;  %v3195_v27 = vpop.f32.mrb[25].mxu1 }
 0x116   :  { %v4229_v33 = vpop.f32.mrb[26].mxu0  ;;  %v4231_v34 = vpop.f32.mrb[26].mxu1 }
 0x117   :  { %v3088_v39 = vpop.f32.mrb[27].mxu0  ;;  %v3196_v40 = vpop.f32.mrb[27].mxu1 }
 0x119   :  { %3310 = vmatmul.mubr.msk.bf16.gmra.mrb[132].mxu0 %vm228_vm2, %v3614_v28  ;;  %3418 = vmatmul.mubr.msk.bf16.gmra.mrb[132].mxu1 %vm228_vm2, %v3615_v29  ;;  %v3618_v28 = vld [vmem:[%s5158_s0 + $0x1e0] sm:$0xff]   ;;  %v3619_v29 = vld [vmem:[%s5158_s0 + $0x2a8] sm:$0xff]  }
 0x11a   :  { %3313 = vmatprep.mubr.msk.bf16.mxu0 %vm3678_vm1, %v5165_v1  ;;  %3421 = vmatprep.mubr.msk.bf16.mxu1 %vm3678_vm1, %v5165_v1 }
 0x11c   :  { %v4241_v41 = vpop.f32.mrb[28].mxu0  ;;  %v4243_v45 = vpop.f32.mrb[28].mxu1 }
 0x11d   :  { %v3091_v50 = vpop.f32.mrb[29].mxu0  ;;  %v3199_v51 = vpop.f32.mrb[29].mxu1 }
 0x11e   :  { %v4253_v57 = vpop.f32.mrb[30].mxu0  ;;  %v4255_v58 = vpop.f32.mrb[30].mxu1 }
 0x11f   :  { %v3092_v3 = vpop.f32.mrb[31].mxu0  ;;  %v3200_v4 = vpop.f32.mrb[31].mxu1 }
 0x121   :  { %3314 = vmatmul.mubr.msk.bf16.gmra.mrb[136].mxu0 %vm228_vm2, %v3616_v52  ;;  %3422 = vmatmul.mubr.msk.bf16.gmra.mrb[136].mxu1 %vm228_vm2, %v3617_v53 }
 0x122   :  { %3317 = vmatprep.mubr.msk.bf16.mxu0 %vm3678_vm1, %v5165_v1  ;;  %3425 = vmatprep.mubr.msk.bf16.mxu1 %vm3678_vm1, %v5165_v1 }
 0x124   :  { %v4265_v5 = vpop.f32.mrb[32].mxu0  ;;  %v4267_v15 = vpop.f32.mrb[32].mxu1 }
 0x125   :  { %v3095_v26 = vpop.f32.mrb[33].mxu0  ;;  %v3203_v27 = vpop.f32.mrb[33].mxu1 }
 0x126   :  { %v4277_v39 = vpop.f32.mrb[34].mxu0  ;;  %v4279_v40 = vpop.f32.mrb[34].mxu1 }
 0x127   :  { %v3096_v51 = vpop.f32.mrb[35].mxu0  ;;  %v3204_v52 = vpop.f32.mrb[35].mxu1 }
 0x129   :  { %3318 = vmatmul.mubr.msk.bf16.gmra.mrb[140].mxu0 %vm228_vm2, %v3618_v28  ;;  %3426 = vmatmul.mubr.msk.bf16.gmra.mrb[140].mxu1 %vm228_vm2, %v3619_v29  ;;  %v3620_v28 = vld [vmem:[%s5158_s0 + $0x1e8] sm:$0xff]   ;;  %v3621_v29 = vld [vmem:[%s5158_s0 + $0x2b0] sm:$0xff]  }
 0x12a   :  { %3321 = vmatprep.mubr.msk.bf16.mxu0 %vm3678_vm1, %v5165_v1  ;;  %3429 = vmatprep.mubr.msk.bf16.mxu1 %vm3678_vm1, %v5165_v1 }
 0x12c   :  { %v4289_v53 = vpop.f32.mrb[36].mxu0  ;;  %v4291_v3 = vpop.f32.mrb[36].mxu1 }
 0x12d   :  { %v3099_v26 = vpop.f32.mrb[37].mxu0  ;;  %v3207_v27 = vpop.f32.mrb[37].mxu1 }
 0x12e   :  { %v4301_v51 = vpop.f32.mrb[38].mxu0  ;;  %v4303_v52 = vpop.f32.mrb[38].mxu1 }
 0x12f   :  { %v3100_v16 = vpop.f32.mrb[39].mxu0  ;;  %v3208_v2 = vpop.f32.mrb[39].mxu1 }
 0x130   :  { %v3622_v2 = vld [vmem:[%s5158_s0 + $0x1f0] sm:$0xff]  }
 0x131   :  { %3322 = vmatmul.mubr.msk.bf16.gmra.mrb[144].mxu0 %vm228_vm2, %v3620_v28  ;;  %3430 = vmatmul.mubr.msk.bf16.gmra.mrb[144].mxu1 %vm228_vm2, %v3621_v29  ;;  %v3623_v28 = vld [vmem:[%s5158_s0 + $0x2b8] sm:$0xff]  }
 0x132   :  { %3325 = vmatprep.mubr.msk.bf16.mxu0 %vm3678_vm1, %v5165_v1  ;;  %3433 = vmatprep.mubr.msk.bf16.mxu1 %vm3678_vm1, %v5165_v1 }
 0x134   :  { %v4313_v26 = vpop.f32.mrb[40].mxu0  ;;  %v4315_v27 = vpop.f32.mrb[40].mxu1 }
 0x135   :  { %v3103_v50 = vpop.f32.mrb[41].mxu0  ;;  %v3211_v16 = vpop.f32.mrb[41].mxu1 }
 0x136   :  { %v4325_v29 = vpop.f32.mrb[42].mxu0  ;;  %v4327_v46 = vpop.f32.mrb[42].mxu1 }
 0x137   :  { %v3104_v22 = vpop.f32.mrb[43].mxu0  ;;  %v3212_v14 = vpop.f32.mrb[43].mxu1 }
 0x138   :  { %v3624_v14 = vld [vmem:[%s5158_s0 + $0x1f8] sm:$0xff]  }
 0x139   :  { %3326 = vmatmul.mubr.msk.bf16.gmra.mrb[148].mxu0 %vm228_vm2, %v3622_v2  ;;  %3434 = vmatmul.mubr.msk.bf16.gmra.mrb[148].mxu1 %vm228_vm2, %v3623_v28  ;;  %v3625_v2 = vld [vmem:[%s5158_s0 + $0x2c0] sm:$0xff]  }
 0x13a   :  { %3329 = vmatprep.mubr.msk.bf16.mxu0 %vm3678_vm1, %v5165_v1  ;;  %3437 = vmatprep.mubr.msk.bf16.mxu1 %vm3678_vm1, %v5165_v1 }
 0x13c   :  { %v4337_v50 = vpop.f32.mrb[44].mxu0  ;;  %v4339_v16 = vpop.f32.mrb[44].mxu1 }
 0x13d   :  { %v3107_v38 = vpop.f32.mrb[45].mxu0  ;;  %v3215_v22 = vpop.f32.mrb[45].mxu1 }
 0x13e   :  { %v4349_v28 = vpop.f32.mrb[46].mxu0  ;;  %v4351_v61 = vpop.f32.mrb[46].mxu1 }
 0x13f   :  { %5224 = vst [vmem:[#allocation5_spill] sm:$0xff] %v4351_v61  ;;  %v3108_v49 = vpop.f32.mrb[47].mxu0  ;;  %v3216_v44 = vpop.f32.mrb[47].mxu1 }
 0x140   :  { %v3626_v44 = vld [vmem:[%s5158_s0 + $0x200] sm:$0xff]  }
 0x141   :  { %3330 = vmatmul.mubr.msk.bf16.gmra.mrb[152].mxu0 %vm228_vm2, %v3624_v14  ;;  %3438 = vmatmul.mubr.msk.bf16.gmra.mrb[152].mxu1 %vm228_vm2, %v3625_v2  ;;  %v3627_v14 = vld [vmem:[%s5158_s0 + $0x2c8] sm:$0xff]  }
 0x142   :  { %3333 = vmatprep.mubr.msk.bf16.mxu0 %vm3678_vm1, %v5165_v1  ;;  %3441 = vmatprep.mubr.msk.bf16.mxu1 %vm3678_vm1, %v5165_v1 }
 0x144   :  { %v4361_v38 = vpop.f32.mrb[48].mxu0  ;;  %v4363_v22 = vpop.f32.mrb[48].mxu1 }
 0x145   :  { %5225 = vst [vmem:[#allocation6_spill] sm:$0xff] %v4361_v38  ;;  %5226 = vst [vmem:[#allocation7_spill] sm:$0xff] %v4363_v22  ;;  %v3111_v56 = vpop.f32.mrb[49].mxu0  ;;  %v3219_v49 = vpop.f32.mrb[49].mxu1  ;;  %v5279_v38 = vmax.f32 %v4073_v62, %v4075_v63  ;;  %v4691_v63 = vld [vmem:[%s5161_s3] sm:$0xff] }
 0x146   :  { %v4373_v2 = vpop.f32.mrb[50].mxu0  ;;  %v4375_v37 = vpop.f32.mrb[50].mxu1  ;;  %v2438_v56 = vld [vmem:[%s5162_s4] sm:$0xff]  ;;  %v2439_v49 = vld [vmem:[%s5162_s4 + $0x8] sm:$0xff]  ;;  %5281 = vst [vmem:[#allocation58_spill] sm:$0xff] %v4691_v63 }
 0x147   :  { %5227 = vst [vmem:[#allocation8_spill] sm:$0xff] %v4373_v2  ;;  %5228 = vst [vmem:[#allocation9_spill] sm:$0xff] %v4375_v37  ;;  %v3112_v25 = vpop.f32.mrb[51].mxu0  ;;  %v3220_v20 = vpop.f32.mrb[51].mxu1 }
 0x148   :  { %v5168_v25 = vmov 0.0|0.0   ;;  %v3519_v20 = vpack.c.bf16 %v2439_v49, %v2438_v56 }
 0x149   :  { %3334 = vmatmul.mubr.msk.bf16.gmra.mrb[156].mxu0 %vm228_vm2, %v3626_v44  ;;  %3442 = vmatmul.mubr.msk.bf16.gmra.mrb[156].mxu1 %vm228_vm2, %v3627_v14 }
 0x14a   :  { %3337 = vmatprep.mubr.msk.bf16.mxu0 %vm3678_vm1, %v5165_v1  ;;  %3445 = vmatprep.mubr.msk.bf16.mxu1 %vm3678_vm1, %v5165_v1 }
 0x14b   :  { %3518 = vmatprep.subr.bf16.mxu0 %v5168_v25 }
 0x14c   :  { %v4392_v44 = vpop.f32.mrb[52].mxu0  ;;  %v4394_v14 = vpop.f32.mrb[52].mxu1  ;;  %3520 = vmatpush3.bf16.msra.mxu0 %v3519_v20 }
 0x14d   :  { %5229 = vst [vmem:[#allocation10_spill] sm:$0xff] %v4392_v44  ;;  %5230 = vst [vmem:[#allocation11_spill] sm:$0xff] %v4394_v14  ;;  %v3115_v4 = vpop.f32.mrb[53].mxu0  ;;  %v3223_v13 = vpop.f32.mrb[53].mxu1  ;;  %3521 = vmatprep.subr.bf16.mxu0 %v5168_v25 }
 0x14e   :  { %v4404_v1 = vpop.f32.mrb[54].mxu0  ;;  %v4406_v56 = vpop.f32.mrb[54].mxu1 }
 0x14f   :  { %5231 = vst [vmem:[#allocation12_spill] sm:$0xff] %v4404_v1  ;;  %5232 = vst [vmem:[#allocation13_spill] sm:$0xff] %v4406_v56  ;;  %v3116_v4 = vpop.f32.mrb[55].mxu0  ;;  %v3224_v13 = vpop.f32.mrb[55].mxu1 }
 0x151   :  { %3338 = vmatmul.mubr.msk.bf16.gmra.mrb[160].mxu0 %vm228_vm2, %v3628_v8  ;;  %3446 = vmatmul.mubr.msk.bf16.gmra.mrb[160].mxu1 %vm228_vm2, %v3629_v0  ;;  %v3630_v8 = vld [vmem:[%s5158_s0 + $0x210] sm:$0xff]   ;;  %v3631_v0 = vld [vmem:[%s5158_s0 + $0x2d8] sm:$0xff]  }
 0x152   :  { %3341 = vmatprep.mubr.msk.bf16.mxu0 %vm3678_vm1, %v5233_v32  ;;  %3449 = vmatprep.mubr.msk.bf16.mxu1 %vm3678_vm1, %v5233_v32 }
 0x154   :  { %v4417_v20 = vpop.f32.mrb[56].mxu0  ;;  %v4419_v14 = vpop.f32.mrb[56].mxu1 }
 0x155   :  { %5234 = vst [vmem:[#allocation14_spill] sm:$0xff] %v4417_v20  ;;  %5235 = vst [vmem:[#allocation15_spill] sm:$0xff] %v4419_v14  ;;  %v3119_v49 = vpop.f32.mrb[57].mxu0  ;;  %v3227_v4 = vpop.f32.mrb[57].mxu1 }
 0x156   :  { %v4429_v13 = vpop.f32.mrb[58].mxu0  ;;  %v4431_v56 = vpop.f32.mrb[58].mxu1 }
 0x157   :  { %5236 = vst [vmem:[#allocation16_spill] sm:$0xff] %v4429_v13  ;;  %5237 = vst [vmem:[#allocation17_spill] sm:$0xff] %v4431_v56  ;;  %v3120_v44 = vpop.f32.mrb[59].mxu0  ;;  %v3228_v37 = vpop.f32.mrb[59].mxu1 }
 0x158   :  { %v3632_v37 = vld [vmem:[%s5158_s0 + $0x218] sm:$0xff]  }
 0x159   :  { %3342 = vmatmul.mubr.msk.bf16.gmra.mrb[164].mxu0 %vm228_vm2, %v3630_v8  ;;  %3450 = vmatmul.mubr.msk.bf16.gmra.mrb[164].mxu1 %vm228_vm2, %v3631_v0  ;;  %v3633_v8 = vld [vmem:[%s5158_s0 + $0x2e0] sm:$0xff]  }
 0x15a   :  { %3345 = vmatprep.mubr.msk.bf16.mxu0 %vm3678_vm1, %v5233_v32  ;;  %3453 = vmatprep.mubr.msk.bf16.mxu1 %vm3678_vm1, %v5233_v32 }
 0x15c   :  { %v4441_v49 = vpop.f32.mrb[60].mxu0  ;;  %v4443_v4 = vpop.f32.mrb[60].mxu1 }
 0x15d   :  { %5238 = vst [vmem:[#allocation18_spill] sm:$0xff] %v4441_v49  ;;  %5239 = vst [vmem:[#allocation19_spill] sm:$0xff] %v4443_v4  ;;  %v3123_v1 = vpop.f32.mrb[61].mxu0  ;;  %v3231_v44 = vpop.f32.mrb[61].mxu1 }
 0x15e   :  { %v4453_v0 = vpop.f32.mrb[62].mxu0  ;;  %v4455_v56 = vpop.f32.mrb[62].mxu1  ;;  %v2440_v1 = vld [vmem:[%s5162_s4 + $0x10] sm:$0xff]  ;;  %v2441_v44 = vld [vmem:[%s5162_s4 + $0x18] sm:$0xff] }
 0x15f   :  { %5240 = vst [vmem:[#allocation20_spill] sm:$0xff] %v4453_v0  ;;  %5241 = vst [vmem:[#allocation21_spill] sm:$0xff] %v4455_v56  ;;  %v3124_v14 = vpop.f32.mrb[63].mxu0  ;;  %v3232_v20 = vpop.f32.mrb[63].mxu1  ;;  %v3634_v56 = vld [vmem:[%s5158_s0 + $0x220] sm:$0xff]   ;;  %v3635_v0 = vld [vmem:[%s5158_s0 + $0x2e8] sm:$0xff]  }
 0x160   :  { %v3522_v14 = vpack.c.bf16 %v2441_v44, %v2440_v1  ;;  %v5246_v44 = vmov 0.0|0.0  }
 0x161   :  { %3346 = vmatmul.mubr.msk.bf16.gmra.mrb[168].mxu0 %vm228_vm2, %v3632_v37  ;;  %3454 = vmatmul.mubr.msk.bf16.gmra.mrb[168].mxu1 %vm228_vm2, %v3633_v8 }
 0x162   :  { %3349 = vmatprep.mubr.msk.bf16.mxu0 %vm3678_vm1, %v5233_v32  ;;  %3457 = vmatprep.mubr.msk.bf16.mxu1 %vm3678_vm1, %v5233_v32 }
 0x163   :  { %3523 = vmatpush3.bf16.msra.mxu0 %v3522_v14 }
 0x164   :  { %v4471_v20 = vpop.f32.mrb[64].mxu0  ;;  %v4473_v37 = vpop.f32.mrb[64].mxu1  ;;  %3524 = vmatprep.subr.bf16.mxu0 %v5246_v44 }
 0x165   :  { %5242 = vst [vmem:[#allocation22_spill] sm:$0xff] %v4471_v20  ;;  %5243 = vst [vmem:[#allocation23_spill] sm:$0xff] %v4473_v37  ;;  %v3127_v13 = vpop.f32.mrb[65].mxu0  ;;  %v3235_v25 = vpop.f32.mrb[65].mxu1 }
 0x166   :  { %v4483_v4 = vpop.f32.mrb[66].mxu0  ;;  %v4485_v1 = vpop.f32.mrb[66].mxu1 }
 0x167   :  { %5244 = vst [vmem:[#allocation24_spill] sm:$0xff] %v4483_v4  ;;  %5245 = vst [vmem:[#allocation25_spill] sm:$0xff] %v4485_v1  ;;  %v3128_v13 = vpop.f32.mrb[67].mxu0  ;;  %v3236_v25 = vpop.f32.mrb[67].mxu1 }
 0x169   :  { %3350 = vmatmul.mubr.msk.bf16.gmra.mrb[172].mxu0 %vm228_vm2, %v3634_v56  ;;  %3458 = vmatmul.mubr.msk.bf16.gmra.mrb[172].mxu1 %vm228_vm2, %v3635_v0  ;;  %v3636_v56 = vld [vmem:[%s5158_s0 + $0x228] sm:$0xff]   ;;  %v3637_v0 = vld [vmem:[%s5158_s0 + $0x2f0] sm:$0xff]  }
 0x16a   :  { %3353 = vmatprep.mubr.msk.bf16.mxu0 %vm3678_vm1, %v5233_v32  ;;  %3461 = vmatprep.mubr.msk.bf16.mxu1 %vm3678_vm1, %v5233_v32 }
 0x16c   :  { %v4496_v14 = vpop.f32.mrb[68].mxu0  ;;  %v4498_v37 = vpop.f32.mrb[68].mxu1 }
 0x16d   :  { %5247 = vst [vmem:[#allocation26_spill] sm:$0xff] %v4496_v14  ;;  %5248 = vst [vmem:[#allocation27_spill] sm:$0xff] %v4498_v37  ;;  %v3131_v8 = vpop.f32.mrb[69].mxu0  ;;  %v3239_v13 = vpop.f32.mrb[69].mxu1 }
 0x16e   :  { %v4508_v25 = vpop.f32.mrb[70].mxu0  ;;  %v4510_v1 = vpop.f32.mrb[70].mxu1 }
 0x16f   :  { %5249 = vst [vmem:[#allocation28_spill] sm:$0xff] %v4508_v25  ;;  %5250 = vst [vmem:[#allocation29_spill] sm:$0xff] %v4510_v1  ;;  %v3132_v49 = vpop.f32.mrb[71].mxu0  ;;  %v3240_v2 = vpop.f32.mrb[71].mxu1 }
 0x170   :  { %v3638_v2 = vld [vmem:[%s5158_s0 + $0x230] sm:$0xff]  }
 0x171   :  { %3354 = vmatmul.mubr.msk.bf16.gmra.mrb[176].mxu0 %vm228_vm2, %v3636_v56  ;;  %3462 = vmatmul.mubr.msk.bf16.gmra.mrb[176].mxu1 %vm228_vm2, %v3637_v0  ;;  %v3639_v56 = vld [vmem:[%s5158_s0 + $0x2f8] sm:$0xff]  }
 0x172   :  { %3357 = vmatprep.mubr.msk.bf16.mxu0 %vm3678_vm1, %v5233_v32  ;;  %3465 = vmatprep.mubr.msk.bf16.mxu1 %vm3678_vm1, %v5233_v32 }
 0x174   :  { %v4520_v8 = vpop.f32.mrb[72].mxu0  ;;  %v4522_v13 = vpop.f32.mrb[72].mxu1 }
 0x175   :  { %5251 = vst [vmem:[#allocation30_spill] sm:$0xff] %v4520_v8  ;;  %5252 = vst [vmem:[#allocation31_spill] sm:$0xff] %v4522_v13  ;;  %v3135_v4 = vpop.f32.mrb[73].mxu0  ;;  %v3243_v49 = vpop.f32.mrb[73].mxu1 }
 0x176   :  { %v4532_v0 = vpop.f32.mrb[74].mxu0  ;;  %v4534_v1 = vpop.f32.mrb[74].mxu1 }
 0x177   :  { %5253 = vst [vmem:[#allocation32_spill] sm:$0xff] %v4532_v0  ;;  %5254 = vst [vmem:[#allocation33_spill] sm:$0xff] %v4534_v1  ;;  %v3136_v37 = vpop.f32.mrb[75].mxu0  ;;  %v3244_v14 = vpop.f32.mrb[75].mxu1 }
 0x178   :  { %v3640_v14 = vld [vmem:[%s5158_s0 + $0x238] sm:$0xff]  }
 0x179   :  { %3358 = vmatmul.mubr.msk.bf16.gmra.mrb[180].mxu0 %vm228_vm2, %v3638_v2  ;;  %3466 = vmatmul.mubr.msk.bf16.gmra.mrb[180].mxu1 %vm228_vm2, %v3639_v56  ;;  %v3641_v2 = vld [vmem:[%s5158_s0 + $0x300] sm:$0xff]  }
 0x17a   :  { %3361 = vmatprep.mubr.msk.bf16.mxu0 %vm3678_vm1, %v5233_v32  ;;  %3469 = vmatprep.mubr.msk.bf16.mxu1 %vm3678_vm1, %v5233_v32 }
 0x17c   :  { %v4544_v4 = vpop.f32.mrb[76].mxu0  ;;  %v4546_v49 = vpop.f32.mrb[76].mxu1 }
 0x17d   :  { %5255 = vst [vmem:[#allocation34_spill] sm:$0xff] %v4544_v4  ;;  %5256 = vst [vmem:[#allocation35_spill] sm:$0xff] %v4546_v49  ;;  %v3139_v25 = vpop.f32.mrb[77].mxu0  ;;  %v3247_v37 = vpop.f32.mrb[77].mxu1 }
 0x17e   :  { %v4556_v56 = vpop.f32.mrb[78].mxu0  ;;  %v4558_v1 = vpop.f32.mrb[78].mxu1  ;;  %v2442_v25 = vld [vmem:[%s5162_s4 + $0x20] sm:$0xff]  ;;  %v2443_v37 = vld [vmem:[%s5162_s4 + $0x28] sm:$0xff] }
 0x17f   :  { %5257 = vst [vmem:[#allocation36_spill] sm:$0xff] %v4556_v56  ;;  %5258 = vst [vmem:[#allocation37_spill] sm:$0xff] %v4558_v1  ;;  %v3140_v13 = vpop.f32.mrb[79].mxu0  ;;  %v3248_v8 = vpop.f32.mrb[79].mxu1  ;;  %v3525_v20 = vpack.c.bf16 %v2443_v37, %v2442_v25  ;;  %v3643_v25 = vld [vmem:[%s5158_s0 + $0x308] sm:$0xff]  }
 0x181   :  { %3362 = vmatmul.mubr.msk.bf16.gmra.mrb[184].mxu0 %vm228_vm2, %v3640_v14  ;;  %3470 = vmatmul.mubr.msk.bf16.gmra.mrb[184].mxu1 %vm228_vm2, %v3641_v2  ;;  %v3642_v2 = vld [vmem:[%s5158_s0 + $0x240] sm:$0xff]  }
 0x182   :  { %3365 = vmatprep.mubr.msk.bf16.mxu0 %vm3678_vm1, %v5233_v32  ;;  %3473 = vmatprep.mubr.msk.bf16.mxu1 %vm3678_vm1, %v5233_v32 }
 0x183   :  { %3526 = vmatpush3.bf16.msra.mxu0 %v3525_v20 }
 0x184   :  { %v4574_v8 = vpop.f32.mrb[80].mxu0  ;;  %v4576_v13 = vpop.f32.mrb[80].mxu1  ;;  %3527 = vmatprep.subr.bf16.mxu0 %v5246_v44 }
 0x185   :  { %5259 = vst [vmem:[#allocation38_spill] sm:$0xff] %v4574_v8  ;;  %5260 = vst [vmem:[#allocation39_spill] sm:$0xff] %v4576_v13  ;;  %v3143_v14 = vpop.f32.mrb[81].mxu0  ;;  %v3251_v1 = vpop.f32.mrb[81].mxu1 }
 0x186   :  { %v4587_v20 = vpop.f32.mrb[82].mxu0  ;;  %v4589_v37 = vpop.f32.mrb[82].mxu1 }
 0x187   :  { %5261 = vst [vmem:[#allocation40_spill] sm:$0xff] %v4587_v20  ;;  %5262 = vst [vmem:[#allocation41_spill] sm:$0xff] %v4589_v37  ;;  %v3144_v49 = vpop.f32.mrb[83].mxu0  ;;  %v3252_v4 = vpop.f32.mrb[83].mxu1 }
 0x188   :  { %v3644_v4 = vld [vmem:[%s5158_s0 + $0x248] sm:$0xff]  }
 0x189   :  { %3366 = vmatmul.mubr.msk.bf16.gmra.mrb[188].mxu0 %vm228_vm2, %v3642_v2  ;;  %3474 = vmatmul.mubr.msk.bf16.gmra.mrb[188].mxu1 %vm228_vm2, %v3643_v25  ;;  %v3645_v2 = vld [vmem:[%s5158_s0 + $0x310] sm:$0xff]  }
 0x18a   :  { %3369 = vmatprep.mubr.msk.bf16.mxu0 %vm3678_vm1, %v5233_v32  ;;  %3477 = vmatprep.mubr.msk.bf16.mxu1 %vm3678_vm1, %v5233_v32 }
 0x18c   :  { %v4599_v1 = vpop.f32.mrb[84].mxu0  ;;  %v4601_v14 = vpop.f32.mrb[84].mxu1 }
 0x18d   :  { %5263 = vst [vmem:[#allocation42_spill] sm:$0xff] %v4599_v1  ;;  %5264 = vst [vmem:[#allocation43_spill] sm:$0xff] %v4601_v14  ;;  %v3147_v56 = vpop.f32.mrb[85].mxu0  ;;  %v3255_v49 = vpop.f32.mrb[85].mxu1 }
 0x18e   :  { %v4611_v25 = vpop.f32.mrb[86].mxu0  ;;  %v4613_v37 = vpop.f32.mrb[86].mxu1 }
 0x18f   :  { %5265 = vst [vmem:[#allocation44_spill] sm:$0xff] %v4611_v25  ;;  %5266 = vst [vmem:[#allocation45_spill] sm:$0xff] %v4613_v37  ;;  %v3148_v13 = vpop.f32.mrb[87].mxu0  ;;  %v3256_v8 = vpop.f32.mrb[87].mxu1  ;;  %v2444_v25 = vld [vmem:[%s5162_s4 + $0x30] sm:$0xff] }
 0x190   :  { %v3646_v8 = vld [vmem:[%s5158_s0 + $0x250] sm:$0xff]  }
 0x191   :  { %3370 = vmatmul.mubr.msk.bf16.gmra.mrb[192].mxu0 %vm228_vm2, %v3644_v4  ;;  %3478 = vmatmul.mubr.msk.bf16.gmra.mrb[192].mxu1 %vm228_vm2, %v3645_v2  ;;  %v3647_v4 = vld [vmem:[%s5158_s0 + $0x318] sm:$0xff]  }
 0x192   :  { %3373 = vmatprep.mubr.msk.bf16.mxu0 %vm3678_vm1, %v5233_v32  ;;  %3481 = vmatprep.mubr.msk.bf16.mxu1 %vm3678_vm1, %v5233_v32 }
 0x194   :  { %v4623_v56 = vpop.f32.mrb[88].mxu0  ;;  %v4625_v49 = vpop.f32.mrb[88].mxu1 }
 0x195   :  { %5267 = vst [vmem:[#allocation46_spill] sm:$0xff] %v4623_v56  ;;  %5268 = vst [vmem:[#allocation47_spill] sm:$0xff] %v4625_v49  ;;  %v3151_v20 = vpop.f32.mrb[89].mxu0  ;;  %v3259_v13 = vpop.f32.mrb[89].mxu1 }
 0x196   :  { %v4635_v2 = vpop.f32.mrb[90].mxu0  ;;  %v4637_v37 = vpop.f32.mrb[90].mxu1 }
 0x197   :  { %5269 = vst [vmem:[#allocation48_spill] sm:$0xff] %v4635_v2  ;;  %5270 = vst [vmem:[#allocation49_spill] sm:$0xff] %v4637_v37  ;;  %v3152_v14 = vpop.f32.mrb[91].mxu0  ;;  %v3260_v1 = vpop.f32.mrb[91].mxu1  ;;  %v2445_v37 = vld [vmem:[%s5162_s4 + $0x38] sm:$0xff] }
 0x198   :  { %v3528_v0 = vpack.c.bf16 %v2445_v37, %v2444_v25 }
 0x199   :  { %3374 = vmatmul.mubr.msk.bf16.gmra.mrb[196].mxu0 %vm228_vm2, %v3646_v8  ;;  %3482 = vmatmul.mubr.msk.bf16.gmra.mrb[196].mxu1 %vm228_vm2, %v3647_v4 }
 0x19a   :  { %3515 = vmatprep.mubr.msk.f32.mxu0 %vm3678_vm1, %v5233_v32  ;;  %3529 = vmatpush3.bf16.msra.mxu0 %v3528_v0  ;;  %v4682_v0 = vld [vmem:[%s5160_s2] ss:$0 sm:$0xff] }
 0x19b   :  { %3530 = vmatprep.subr.bf16.mxu0 %v5246_v44 }
 0x19c   :  { %v4645_v20 = vpop.f32.mrb[92].mxu0  ;;  %v4647_v13 = vpop.f32.mrb[92].mxu1 }
 0x19d   :  { %5271 = vst [vmem:[#allocation50_spill] sm:$0xff] %v4645_v20  ;;  %5272 = vst [vmem:[#allocation51_spill] sm:$0xff] %v4647_v13  ;;  %v3155_v49 = vpop.f32.mrb[93].mxu0  ;;  %v3263_v56 = vpop.f32.mrb[93].mxu1 }
 0x19e   :  { %v4651_v22 = vpop.f32.mrb[94].mxu0  ;;  %v4653_v14 = vpop.f32.mrb[94].mxu1 }
 0x19f   :  { %5273 = vst [vmem:[#allocation52_spill] sm:$0xff] %v4651_v22  ;;  %5274 = vst [vmem:[#allocation53_spill] sm:$0xff] %v4653_v14  ;;  %v3156_v8 = vpop.f32.mrb[95].mxu0  ;;  %v3264_v4 = vpop.f32.mrb[95].mxu1 }
 0x1a4   :  { %v4663_v49 = vpop.f32.mrb[96].mxu0  ;;  %v4665_v56 = vpop.f32.mrb[96].mxu1 }
 0x1a5   :  { %5275 = vst [vmem:[#allocation54_spill] sm:$0xff] %v4663_v49  ;;  %5276 = vst [vmem:[#allocation55_spill] sm:$0xff] %v4665_v56  ;;  %v3159_v20 = vpop.f32.mrb[97].mxu0  ;;  %v3267_v1 = vpop.f32.mrb[97].mxu1 }
 0x1a6   :  { %v4669_v8 = vpop.f32.mrb[98].mxu0  ;;  %v4671_v4 = vpop.f32.mrb[98].mxu1 }
 0x1a7   :  { %5277 = vst [vmem:[#allocation56_spill] sm:$0xff] %v4669_v8  ;;  %5278 = vst [vmem:[#allocation57_spill] sm:$0xff] %v4671_v4  ;;  %v3160_v37 = vpop.f32.mrb[99].mxu0  ;;  %v3268_v25 = vpop.f32.mrb[99].mxu1 }
 0x1a8   :  { %v5280_v37 = vmax.f32 %v4085_v6, %v4087_v7 }
 0x1ac   :  { %v1362_v22 = vpop.f32.mrb[100].mxu0  ;;  %v1896_v2 = vpop.f32.mrb[100].mxu1 }
 0x1ad   :  { %v1561_v13 = vmax.f32 %v5279_v38, %v1362_v22  ;;  %v3279_v20 = vpop.f32.mrb[101].mxu0  ;;  %v3387_v1 = vpop.f32.mrb[101].mxu1  ;;  %v2446_v38 = vld [vmem:[%s5162_s4 + $0x40] sm:$0xff]  ;;  %v2447_v22 = vld [vmem:[%s5162_s4 + $0x48] sm:$0xff] }
 0x1ae   :  { %v1365_v56 = vpop.f32.mrb[102].mxu0  ;;  %v1899_v49 = vpop.f32.mrb[102].mxu1 }
 0x1af   :  { %v2095_v61 = vmax.f32 %v1561_v13, %v1896_v2  ;;  %v1562_v25 = vmax.f32 %v5280_v37, %v1365_v56  ;;  %v3280_v14 = vpop.f32.mrb[103].mxu0  ;;  %v3388_v4 = vpop.f32.mrb[103].mxu1  ;;  %v3531_v2 = vpack.c.bf16 %v2447_v22, %v2446_v38  ;;  %v5283_v22 = vmax.f32 %v4109_v18, %v4111_v19  ;;  %v4726_v18 = vld [vmem:[%s5161_s3 + $0x18] sm:$0xff] }
 0x1b0   :  { %v5282_v4 = vmax.f32 %v4097_v11, %v4099_v12 }
 0x1b1   :  { %v2152_v8 = vadd.f32 %v4682_v0, %v2095_v61  ;;  %v2096_v62 = vmax.f32 %v1562_v25, %v1899_v49  ;;  %v4703_v61 = vld [vmem:[%s5161_s3 + $0x8] sm:$0xff]  ;;  %3532 = vmatpush3.bf16.msra.mxu0 %v3531_v2 }
 0x1b2   :  { %3533 = vmatprep.subr.bf16.mxu0 %v5246_v44 }
 0x1b3   :  { %v2202_v6 = vmax.f32 %v2152_v8, 0.0  ;;  %v2153_v7 = vadd.f32 %v4682_v0, %v2096_v62 }
 0x1b4   :  { %v1370_v13 = vpop.f32.mrb[104].mxu0  ;;  %v1904_v14 = vpop.f32.mrb[104].mxu1 }
 0x1b5   :  { %v2277_v49 = vmul.f32 %v4691_v63, %v2202_v6  ;;  %v2203_v56 = vmax.f32 %v2153_v7, 0.0  ;;  %v1563_v20 = vmax.f32 %v5282_v4, %v1370_v13  ;;  %v3283_v1 = vpop.f32.mrb[105].mxu0  ;;  %v3391_v37 = vpop.f32.mrb[105].mxu1 }
 0x1b6   :  { %v1373_v8 = vpop.f32.mrb[106].mxu0  ;;  %v1907_v25 = vpop.f32.mrb[106].mxu1  ;;  %v4720_v1 = vld [vmem:[%s5161_s3 + $0x10] sm:$0xff]  ;;  %v5285_v37 = vmax.f32 %v4121_v23, %v4123_v24 }
 0x1b7   :  { %v2278_v62 = vmul.f32 %v4703_v61, %v2203_v56  ;;  %v2097_v38 = vmax.f32 %v1563_v20, %v1904_v14  ;;  %v1564_v6 = vmax.f32 %v5283_v22, %v1373_v8  ;;  %v3284_v7 = vpop.f32.mrb[107].mxu0  ;;  %v3392_v63 = vpop.f32.mrb[107].mxu1  ;;  %v2328_v11 = vsel %vm2327_vm3, %v2277_v49, 0.0  ;;  %5284 = vst [vmem:[#allocation59_spill] sm:$0xff] %v4720_v1 }
 0x1b9   :  { %v2329_v12 = vsel %vm2327_vm3, %v2278_v62, 0.0  ;;  %v2154_v2 = vadd.f32 %v4682_v0, %v2097_v38  ;;  %v2098_v13 = vmax.f32 %v1564_v6, %v1907_v25 }
 0x1ba   :  { %v2330_v4 = vadd.f32 %v2329_v12, %v2328_v11  ;;  %v5286_v12 = vmax.f32 %v4133_v30, %v4135_v31  ;;  %v4748_v30 = vld [vmem:[%s5161_s3 + $0x28] sm:$0xff] }
 0x1bb   :  { %v2204_v14 = vmax.f32 %v2154_v2, 0.0  ;;  %v2155_v56 = vadd.f32 %v4682_v0, %v2098_v13 }
 0x1bc   :  { %v1378_v19 = vpop.f32.mrb[108].mxu0  ;;  %v1912_v63 = vpop.f32.mrb[108].mxu1 }
 0x1bd   :  { %v2279_v49 = vmul.f32 %v4720_v1, %v2204_v14  ;;  %v2205_v20 = vmax.f32 %v2155_v56, 0.0  ;;  %v1565_v8 = vmax.f32 %v5285_v37, %v1378_v19  ;;  %v3287_v25 = vpop.f32.mrb[109].mxu0  ;;  %v3395_v62 = vpop.f32.mrb[109].mxu1 }
 0x1be   :  { %v1381_v38 = vpop.f32.mrb[110].mxu0  ;;  %v1915_v22 = vpop.f32.mrb[110].mxu1 }
 0x1bf   :  { %v2331_v6 = vsel %vm2327_vm3, %v2279_v49, 0.0  ;;  %v2280_v7 = vmul.f32 %v4726_v18, %v2205_v20  ;;  %v2099_v11 = vmax.f32 %v1565_v8, %v1912_v63  ;;  %v1566_v2 = vmax.f32 %v5286_v12, %v1381_v38  ;;  %v3288_v13 = vpop.f32.mrb[111].mxu0  ;;  %v3396_v14 = vpop.f32.mrb[111].mxu1  ;;  %v4742_v49 = vld [vmem:[%s5161_s3 + $0x20] sm:$0xff] }
 0x1c0   :  { %v2332_v56 = vadd.f32 %v2331_v6, %v2330_v4 }
 0x1c1   :  { %v2333_v1 = vsel %vm2327_vm3, %v2280_v7, 0.0  ;;  %v2156_v23 = vadd.f32 %v4682_v0, %v2099_v11  ;;  %v2100_v24 = vmax.f32 %v1566_v2, %v1915_v22  ;;  %v5288_v2 = vmax.f32 %v4157_v42, %v4159_v43  ;;  %v2449_v42 = vld [vmem:[%s5162_s4 + $0x58] sm:$0xff] }
 0x1c2   :  { %v2334_v19 = vadd.f32 %v2333_v1, %v2332_v56  ;;  %v5287_v1 = vmax.f32 %v4145_v35, %v4147_v36 }
 0x1c3   :  { %v2206_v20 = vmax.f32 %v2156_v23, 0.0  ;;  %v2157_v63 = vadd.f32 %v4682_v0, %v2100_v24 }
 0x1c4   :  { %v1386_v31 = vpop.f32.mrb[112].mxu0  ;;  %v1920_v4 = vpop.f32.mrb[112].mxu1 }
 0x1c5   :  { %v2281_v37 = vmul.f32 %v4742_v49, %v2206_v20  ;;  %v2207_v8 = vmax.f32 %v2157_v63, 0.0  ;;  %v1567_v25 = vmax.f32 %v5287_v1, %v1386_v31  ;;  %v3291_v62 = vpop.f32.mrb[113].mxu0  ;;  %v3399_v38 = vpop.f32.mrb[113].mxu1  ;;  %v4764_v63 = vld [vmem:[%s5161_s3 + $0x30] sm:$0xff] }
 0x1c6   :  { %v1389_v22 = vpop.f32.mrb[114].mxu0  ;;  %v1923_v6 = vpop.f32.mrb[114].mxu1  ;;  %v2448_v31 = vld [vmem:[%s5162_s4 + $0x50] sm:$0xff]  ;;  %v5289_v38 = vmax.f32 %v4169_v47, %v4171_v48 }
 0x1c7   :  { %v2335_v7 = vsel %vm2327_vm3, %v2281_v37, 0.0  ;;  %v2282_v11 = vmul.f32 %v4748_v30, %v2207_v8  ;;  %v2101_v12 = vmax.f32 %v1567_v25, %v1920_v4  ;;  %v1568_v13 = vmax.f32 %v5288_v2, %v1389_v22  ;;  %v3292_v14 = vpop.f32.mrb[115].mxu0  ;;  %v3400_v56 = vpop.f32.mrb[115].mxu1  ;;  %v4776_v37 = vld [vmem:[%s5161_s3 + $0x38] sm:$0xff] }
 0x1c8   :  { %v2336_v23 = vadd.f32 %v2335_v7, %v2334_v19  ;;  %v3534_v4 = vpack.c.bf16 %v2449_v42, %v2448_v31  ;;  %v5290_v56 = vmax.f32 %v4181_v54, %v4183_v55  ;;  %v4799_v54 = vld [vmem:[%s5161_s3 + $0x48] sm:$0xff] }
 0x1c9   :  { %v2337_v24 = vsel %vm2327_vm3, %v2282_v11, 0.0  ;;  %v2158_v35 = vadd.f32 %v4682_v0, %v2101_v12  ;;  %v2102_v36 = vmax.f32 %v1568_v13, %v1923_v6 }
 0x1ca   :  { %v2338_v20 = vadd.f32 %v2337_v24, %v2336_v23  ;;  %3535 = vmatpush3.bf16.msra.mxu0 %v3534_v4 }
 0x1cb   :  { %v2208_v43 = vmax.f32 %v2158_v35, 0.0  ;;  %v2159_v19 = vadd.f32 %v4682_v0, %v2102_v36  ;;  %3536 = vmatprep.subr.bf16.mxu0 %v5246_v44  ;;  %v4793_v44 = vld [vmem:[%s5161_s3 + $0x40] sm:$0xff] }
 0x1cc   :  { %v1394_v8 = vpop.f32.mrb[116].mxu0  ;;  %v1928_v1 = vpop.f32.mrb[116].mxu1 }
 0x1cd   :  { %v2283_v25 = vmul.f32 %v4764_v63, %v2208_v43  ;;  %v2209_v62 = vmax.f32 %v2159_v19, 0.0  ;;  %v1569_v22 = vmax.f32 %v5289_v38, %v1394_v8  ;;  %v3295_v6 = vpop.f32.mrb[117].mxu0  ;;  %v3403_v7 = vpop.f32.mrb[117].mxu1 }
 0x1ce   :  { %v1397_v11 = vpop.f32.mrb[118].mxu0  ;;  %v1931_v12 = vpop.f32.mrb[118].mxu1 }
 0x1cf   :  { %v2339_v2 = vsel %vm2327_vm3, %v2283_v25, 0.0  ;;  %v2284_v13 = vmul.f32 %v4776_v37, %v2209_v62  ;;  %v2103_v14 = vmax.f32 %v1569_v22, %v1928_v1  ;;  %v1570_v23 = vmax.f32 %v5290_v56, %v1397_v11  ;;  %v3296_v24 = vpop.f32.mrb[119].mxu0  ;;  %v3404_v35 = vpop.f32.mrb[119].mxu1 }
 0x1d0   :  { %v2340_v47 = vadd.f32 %v2339_v2, %v2338_v20  ;;  %v5291_v1 = vmax.f32 %v4193_v59, %v4195_v60  ;;  %v5292_v2 = vmax.f32 %v4205_v9, %v4207_v10  ;;  %v4821_v9 = vld [vmem:[%s5161_s3 + $0x58] sm:$0xff] }
 0x1d1   :  { %v2341_v48 = vsel %vm2327_vm3, %v2284_v13, 0.0  ;;  %v2160_v36 = vadd.f32 %v4682_v0, %v2103_v14  ;;  %v2104_v31 = vmax.f32 %v1570_v23, %v1931_v12 }
 0x1d2   :  { %v2342_v42 = vadd.f32 %v2341_v48, %v2340_v47  ;;  %v4815_v47 = vld [vmem:[%s5161_s3 + $0x50] sm:$0xff] }
 0x1d3   :  { %v2210_v43 = vmax.f32 %v2160_v36, 0.0  ;;  %v2161_v19 = vadd.f32 %v4682_v0, %v2104_v31 }
 0x1d4   :  { %v1402_v55 = vpop.f32.mrb[120].mxu0  ;;  %v1936_v20 = vpop.f32.mrb[120].mxu1 }
 0x1d5   :  { %v2285_v4 = vmul.f32 %v4793_v44, %v2210_v43  ;;  %v2211_v8 = vmax.f32 %v2161_v19, 0.0  ;;  %v1571_v25 = vmax.f32 %v5291_v1, %v1402_v55  ;;  %v3299_v62 = vpop.f32.mrb[121].mxu0  ;;  %v3407_v38 = vpop.f32.mrb[121].mxu1  ;;  %v5293_v19 = vmax.f32 %v4217_v17, %v4219_v21 }
 0x1d6   :  { %v1405_v22 = vpop.f32.mrb[122].mxu0  ;;  %v1939_v6 = vpop.f32.mrb[122].mxu1 }
 0x1d7   :  { %v2343_v7 = vsel %vm2327_vm3, %v2285_v4, 0.0  ;;  %v2286_v11 = vmul.f32 %v4799_v54, %v2211_v8  ;;  %v2105_v12 = vmax.f32 %v1571_v25, %v1936_v20  ;;  %v1572_v13 = vmax.f32 %v5292_v2, %v1405_v22  ;;  %v3300_v14 = vpop.f32.mrb[123].mxu0  ;;  %v3408_v56 = vpop.f32.mrb[123].mxu1 }
 0x1d8   :  { %v2344_v23 = vadd.f32 %v2343_v7, %v2342_v42  ;;  %v5294_v22 = vmax.f32 %v4229_v33, %v4231_v34  ;;  %v4837_v14 = vld [vmem:[%s5161_s3 + $0x60] sm:$0xff]  ;;  %v2451_v33 = vld [vmem:[%s5162_s4 + $0x68] sm:$0xff] }
 0x1d9   :  { %v2345_v24 = vsel %vm2327_vm3, %v2286_v11, 0.0  ;;  %v2162_v59 = vadd.f32 %v4682_v0, %v2105_v12  ;;  %v2106_v60 = vmax.f32 %v1572_v13, %v1939_v6  ;;  %v2450_v56 = vld [vmem:[%s5162_s4 + $0x60] sm:$0xff] }
 0x1da   :  { %v2346_v35 = vadd.f32 %v2345_v24, %v2344_v23  ;;  %v3537_v24 = vpack.c.bf16 %v2451_v33, %v2450_v56 }
 0x1db   :  { %v2212_v48 = vmax.f32 %v2162_v59, 0.0  ;;  %v2163_v36 = vadd.f32 %v4682_v0, %v2106_v60  ;;  %v4849_v59 = vld [vmem:[%s5161_s3 + $0x68] sm:$0xff] }
 0x1dc   :  { %v1410_v10 = vpop.f32.mrb[124].mxu0  ;;  %v1944_v31 = vpop.f32.mrb[124].mxu1  ;;  %3538 = vmatpush3.bf16.msra.mxu0 %v3537_v24 }
 0x1dd   :  { %v2287_v42 = vmul.f32 %v4815_v47, %v2212_v48  ;;  %v2213_v43 = vmax.f32 %v2163_v36, 0.0  ;;  %v1573_v55 = vmax.f32 %v5293_v19, %v1410_v10  ;;  %v3303_v20 = vpop.f32.mrb[125].mxu0  ;;  %v3411_v4 = vpop.f32.mrb[125].mxu1  ;;  %v5295_v10 = vmax.f32 %v4241_v41, %v4243_v45  ;;  %3513 = vmatprep.subr.mxu0 %v5233_v32  ;;  %v4866_v32 = vld [vmem:[%s5161_s3 + $0x70] sm:$0xff] }
 0x1de   :  { %v1413_v8 = vpop.f32.mrb[126].mxu0  ;;  %v1947_v1 = vpop.f32.mrb[126].mxu1 }
 0x1df   :  { %v2347_v25 = vsel %vm2327_vm3, %v2287_v42, 0.0  ;;  %v2288_v62 = vmul.f32 %v4821_v9, %v2213_v43  ;;  %v2107_v38 = vmax.f32 %v1573_v55, %v1944_v31  ;;  %v1574_v6 = vmax.f32 %v5294_v22, %v1413_v8  ;;  %v3304_v7 = vpop.f32.mrb[127].mxu0  ;;  %v3412_v11 = vpop.f32.mrb[127].mxu1 }
 0x1e0   :  { %v2348_v12 = vadd.f32 %v2347_v25, %v2346_v35 }
 0x1e1   :  { %v2349_v2 = vsel %vm2327_vm3, %v2288_v62, 0.0  ;;  %v2164_v17 = vadd.f32 %v4682_v0, %v2107_v38  ;;  %v2108_v21 = vmax.f32 %v1574_v6, %v1947_v1  ;;  %v5296_v1 = vmax.f32 %v4253_v57, %v4255_v58  ;;  %v4872_v57 = vld [vmem:[%s5161_s3 + $0x78] sm:$0xff] }
 0x1e2   :  { %v2350_v13 = vadd.f32 %v2349_v2, %v2348_v12 }
 0x1e3   :  { %v2214_v34 = vmax.f32 %v2164_v17, 0.0  ;;  %v2165_v23 = vadd.f32 %v4682_v0, %v2108_v21 }
 0x1e4   :  { %v1418_v60 = vpop.f32.mrb[128].mxu0  ;;  %v1952_v35 = vpop.f32.mrb[128].mxu1 }
 0x1e5   :  { %v2289_v48 = vmul.f32 %v4837_v14, %v2214_v34  ;;  %v2215_v36 = vmax.f32 %v2165_v23, 0.0  ;;  %v1575_v31 = vmax.f32 %v5295_v10, %v1418_v60  ;;  %v3307_v42 = vpop.f32.mrb[129].mxu0  ;;  %v3415_v43 = vpop.f32.mrb[129].mxu1 }
 0x1e6   :  { %v1421_v19 = vpop.f32.mrb[130].mxu0  ;;  %v1955_v55 = vpop.f32.mrb[130].mxu1 }
 0x1e7   :  { %v2351_v20 = vsel %vm2327_vm3, %v2289_v48, 0.0  ;;  %v2290_v4 = vmul.f32 %v4849_v59, %v2215_v36  ;;  %v2109_v8 = vmax.f32 %v1575_v31, %v1952_v35  ;;  %v1576_v25 = vmax.f32 %v5296_v1, %v1421_v19  ;;  %v3308_v62 = vpop.f32.mrb[131].mxu0  ;;  %v3416_v38 = vpop.f32.mrb[131].mxu1 }
 0x1e8   :  { %v2352_v41 = vadd.f32 %v2351_v20, %v2350_v13  ;;  %v5297_v13 = vmax.f32 %v4265_v5, %v4267_v15  ;;  %v5298_v36 = vmax.f32 %v4277_v39, %v4279_v40  ;;  %v4888_v20 = vld [vmem:[%s5161_s3 + $0x80] sm:$0xff]  ;;  %v4894_v39 = vld [vmem:[%s5161_s3 + $0x88] sm:$0xff]  ;;  %v5299_v38 = vmax.f32 %v4289_v53, %v4291_v3 }
 0x1e9   :  { %v2353_v45 = vsel %vm2327_vm3, %v2290_v4, 0.0  ;;  %v2166_v22 = vadd.f32 %v4682_v0, %v2109_v8  ;;  %v2110_v6 = vmax.f32 %v1576_v25, %v1955_v55 }
 0x1ea   :  { %v2354_v7 = vadd.f32 %v2353_v45, %v2352_v41 }
 0x1eb   :  { %v2216_v11 = vmax.f32 %v2166_v22, 0.0  ;;  %v2167_v12 = vadd.f32 %v4682_v0, %v2110_v6 }
 0x1ec   :  { %v1426_v58 = vpop.f32.mrb[132].mxu0  ;;  %v1960_v2 = vpop.f32.mrb[132].mxu1 }
 0x1ed   :  { %v2291_v17 = vmul.f32 %v4866_v32, %v2216_v11  ;;  %v2217_v21 = vmax.f32 %v2167_v12, 0.0  ;;  %v1577_v56 = vmax.f32 %v5297_v13, %v1426_v58  ;;  %v3311_v33 = vpop.f32.mrb[133].mxu0  ;;  %v3419_v34 = vpop.f32.mrb[133].mxu1 }
 0x1ee   :  { %v1429_v23 = vpop.f32.mrb[134].mxu0  ;;  %v1963_v24 = vpop.f32.mrb[134].mxu1 }
 0x1ef   :  { %v2355_v60 = vsel %vm2327_vm3, %v2291_v17, 0.0  ;;  %v2292_v35 = vmul.f32 %v4872_v57, %v2217_v21  ;;  %v2111_v48 = vmax.f32 %v1577_v56, %v1960_v2  ;;  %v1578_v10 = vmax.f32 %v5298_v36, %v1429_v23  ;;  %v3312_v31 = vpop.f32.mrb[135].mxu0  ;;  %v3420_v42 = vpop.f32.mrb[135].mxu1  ;;  %v4910_v23 = vld [vmem:[%s5161_s3 + $0x90] sm:$0xff] }
 0x1f0   :  { %v2356_v43 = vadd.f32 %v2355_v60, %v2354_v7  ;;  %v5300_v2 = vmax.f32 %v4301_v51, %v4303_v52  ;;  %v4916_v51 = vld [vmem:[%s5161_s3 + $0x98] sm:$0xff] }
 0x1f1   :  { %v2357_v19 = vsel %vm2327_vm3, %v2292_v35, 0.0  ;;  %v2168_v5 = vadd.f32 %v4682_v0, %v2111_v48  ;;  %v2112_v15 = vmax.f32 %v1578_v10, %v1963_v24  ;;  %v5301_v10 = vmax.f32 %v4313_v26, %v4315_v27 }
 0x1f2   :  { %v2358_v55 = vadd.f32 %v2357_v19, %v2356_v43 }
 0x1f3   :  { %v2218_v4 = vmax.f32 %v2168_v5, 0.0  ;;  %v2169_v8 = vadd.f32 %v4682_v0, %v2112_v15 }
 0x1f4   :  { %v1434_v40 = vpop.f32.mrb[136].mxu0  ;;  %v1968_v1 = vpop.f32.mrb[136].mxu1 }
 0x1f5   :  { %v2293_v25 = vmul.f32 %v4888_v20, %v2218_v4  ;;  %v2219_v62 = vmax.f32 %v2169_v8, 0.0  ;;  %v1579_v41 = vmax.f32 %v5299_v38, %v1434_v40  ;;  %v3315_v45 = vpop.f32.mrb[137].mxu0  ;;  %v3423_v22 = vpop.f32.mrb[137].mxu1  ;;  %v5302_v8 = vmax.f32 %v4325_v29, %v4327_v46  ;;  %v4938_v46 = vld [vmem:[%s5161_s3 + $0xa8] sm:$0xff] }
 0x1f6   :  { %v1437_v6 = vpop.f32.mrb[138].mxu0  ;;  %v1971_v7 = vpop.f32.mrb[138].mxu1  ;;  %v4932_v45 = vld [vmem:[%s5161_s3 + $0xa0] sm:$0xff] }
 0x1f7   :  { %v2359_v11 = vsel %vm2327_vm3, %v2293_v25, 0.0  ;;  %v2294_v12 = vmul.f32 %v4894_v39, %v2219_v62  ;;  %v2113_v58 = vmax.f32 %v1579_v41, %v1968_v1  ;;  %v1580_v17 = vmax.f32 %v5300_v2, %v1437_v6  ;;  %v3316_v21 = vpop.f32.mrb[139].mxu0  ;;  %v3424_v13 = vpop.f32.mrb[139].mxu1 }
 0x1f8   :  { %v2360_v56 = vadd.f32 %v2359_v11, %v2358_v55  ;;  %v2452_v11 = vld [vmem:[%s5162_s4 + $0x70] sm:$0xff]  ;;  %v5303_v2 = vmax.f32 %v4337_v50, %v4339_v16 }
 0x1f9   :  { %v2361_v33 = vsel %vm2327_vm3, %v2294_v12, 0.0  ;;  %v2170_v53 = vadd.f32 %v4682_v0, %v2113_v58  ;;  %v2114_v3 = vmax.f32 %v1580_v17, %v1971_v7  ;;  %3514 = vmatpush3.msra.mxu0 %v2452_v11 }
 0x1fa   :  { %v2362_v34 = vadd.f32 %v2361_v33, %v2360_v56 }
 0x1fb   :  { %v2220_v24 = vmax.f32 %v2170_v53, 0.0  ;;  %v2171_v60 = vadd.f32 %v4682_v0, %v2114_v3 }
 0x1fc   :  { %v1442_v52 = vpop.f32.mrb[140].mxu0  ;;  %v1976_v35 = vpop.f32.mrb[140].mxu1 }
 0x1fd   :  { %v2295_v48 = vmul.f32 %v4910_v23, %v2220_v24  ;;  %v2221_v36 = vmax.f32 %v2171_v60, 0.0  ;;  %v1581_v31 = vmax.f32 %v5301_v10, %v1442_v52  ;;  %v3319_v42 = vpop.f32.mrb[141].mxu0  ;;  %v3427_v43 = vpop.f32.mrb[141].mxu1  ;;  %v5304_v24 = vld [vmem:[#allocation5_spill] sm:$0xff] }
 0x1fe   :  { %v1445_v19 = vpop.f32.mrb[142].mxu0  ;;  %v1979_v5 = vpop.f32.mrb[142].mxu1  ;;  %v5305_v60 = vmax.f32 %v4349_v28, %v5304_v24  ;;  %v4957_v42 = vld [vmem:[%s5161_s3 + $0xb0] sm:$0xff]  ;;  %v4963_v28 = vld [vmem:[%s5161_s3 + $0xb8] sm:$0xff] }
 0x1ff   :  { %v2363_v15 = vsel %vm2327_vm3, %v2295_v48, 0.0  ;;  %v2296_v55 = vmul.f32 %v4916_v51, %v2221_v36  ;;  %v2115_v4 = vmax.f32 %v1581_v31, %v1976_v35  ;;  %v1582_v40 = vmax.f32 %v5302_v8, %v1445_v19  ;;  %v3320_v1 = vpop.f32.mrb[143].mxu0  ;;  %v3428_v25 = vpop.f32.mrb[143].mxu1  ;;  %v5306_v8 = vld [vmem:[#allocation6_spill] sm:$0xff] }
 0x200   :  { %v2364_v62 = vadd.f32 %v2363_v15, %v2362_v34 }
 0x201   :  { %v2365_v38 = vsel %vm2327_vm3, %v2296_v55, 0.0  ;;  %v2172_v26 = vadd.f32 %v4682_v0, %v2115_v4  ;;  %v2116_v27 = vmax.f32 %v1582_v40, %v1979_v5  ;;  %v5307_v40 = vld [vmem:[#allocation7_spill] sm:$0xff] }
 0x202   :  { %v2366_v41 = vadd.f32 %v2365_v38, %v2364_v62  ;;  %v5308_v1 = vmax.f32 %v5306_v8, %v5307_v40 }
 0x203   :  { %v2222_v22 = vmax.f32 %v2172_v26, 0.0  ;;  %v2173_v6 = vadd.f32 %v4682_v0, %v2116_v27 }
 0x204   :  { %v1450_v29 = vpop.f32.mrb[144].mxu0  ;;  %v1984_v7 = vpop.f32.mrb[144].mxu1 }
 0x205   :  { %v2297_v12 = vmul.f32 %v4932_v45, %v2222_v22  ;;  %v2223_v58 = vmax.f32 %v2173_v6, 0.0  ;;  %v1583_v17 = vmax.f32 %v5303_v2, %v1450_v29  ;;  %v3323_v21 = vpop.f32.mrb[145].mxu0  ;;  %v3431_v13 = vpop.f32.mrb[145].mxu1  ;;  %v5309_v29 = vld [vmem:[#allocation8_spill] sm:$0xff] }
 0x206   :  { %v1453_v56 = vpop.f32.mrb[146].mxu0  ;;  %v1987_v33 = vpop.f32.mrb[146].mxu1 }
 0x207   :  { %v2367_v53 = vsel %vm2327_vm3, %v2297_v12, 0.0  ;;  %v2298_v3 = vmul.f32 %v4938_v46, %v2223_v58  ;;  %v2117_v34 = vmax.f32 %v1583_v17, %v1984_v7  ;;  %v1584_v52 = vmax.f32 %v5305_v60, %v1453_v56  ;;  %v3324_v35 = vpop.f32.mrb[147].mxu0  ;;  %v3432_v48 = vpop.f32.mrb[147].mxu1  ;;  %v5310_v7 = vld [vmem:[#allocation9_spill] sm:$0xff] }
 0x208   :  { %v2368_v36 = vadd.f32 %v2367_v53, %v2366_v41  ;;  %v5311_v11 = vmax.f32 %v5309_v29, %v5310_v7  ;;  %v4979_v53 = vld [vmem:[%s5161_s3 + $0xc0] sm:$0xff]  ;;  %v5312_v35 = vld [vmem:[#allocation10_spill] sm:$0xff]  ;;  %v5313_v48 = vld [vmem:[#allocation11_spill] sm:$0xff] }
 0x209   :  { %v2369_v50 = vsel %vm2327_vm3, %v2298_v3, 0.0  ;;  %v2174_v16 = vadd.f32 %v4682_v0, %v2117_v34  ;;  %v2118_v10 = vmax.f32 %v1584_v52, %v1987_v33 }
 0x20a   :  { %v2370_v31 = vadd.f32 %v2369_v50, %v2368_v36  ;;  %v5314_v36 = vmax.f32 %v5312_v35, %v5313_v48  ;;  %v5323_v48 = vld [vmem:[#allocation16_spill] sm:$0xff] }
 0x20b   :  { %v2224_v43 = vmax.f32 %v2174_v16, 0.0  ;;  %v2175_v19 = vadd.f32 %v4682_v0, %v2118_v10 }
 0x20c   :  { %v1458_v5 = vpop.f32.mrb[148].mxu0  ;;  %v1992_v15 = vpop.f32.mrb[148].mxu1 }
 0x20d   :  { %v2299_v55 = vmul.f32 %v4957_v42, %v2224_v43  ;;  %v2225_v4 = vmax.f32 %v2175_v19, 0.0  ;;  %v1585_v25 = vmax.f32 %v5308_v1, %v1458_v5  ;;  %v3327_v62 = vpop.f32.mrb[149].mxu0  ;;  %v3435_v38 = vpop.f32.mrb[149].mxu1 }
 0x20e   :  { %v1461_v26 = vpop.f32.mrb[150].mxu0  ;;  %v1995_v27 = vpop.f32.mrb[150].mxu1 }
 0x20f   :  { %v2371_v41 = vsel %vm2327_vm3, %v2299_v55, 0.0  ;;  %v2300_v22 = vmul.f32 %v4963_v28, %v2225_v4  ;;  %v2119_v6 = vmax.f32 %v1585_v25, %v1992_v15  ;;  %v1586_v12 = vmax.f32 %v5311_v11, %v1461_v26  ;;  %v3328_v58 = vpop.f32.mrb[151].mxu0  ;;  %v3436_v2 = vpop.f32.mrb[151].mxu1  ;;  %v5315_v55 = vld [vmem:[#allocation12_spill] sm:$0xff]  ;;  %v5316_v4 = vld [vmem:[#allocation13_spill] sm:$0xff] }
 0x210   :  { %v2372_v17 = vadd.f32 %v2371_v41, %v2370_v31  ;;  %v5317_v8 = vmax.f32 %v5315_v55, %v5316_v4  ;;  %v5319_v58 = vld [vmem:[#allocation14_spill] sm:$0xff]  ;;  %v5320_v2 = vld [vmem:[#allocation15_spill] sm:$0xff] }
 0x211   :  { %v2373_v21 = vsel %vm2327_vm3, %v2300_v22, 0.0  ;;  %v2176_v13 = vadd.f32 %v4682_v0, %v2119_v6  ;;  %v2120_v56 = vmax.f32 %v1586_v12, %v1995_v27  ;;  %v5318_v27 = vld [vmem:[#allocation58_spill] sm:$0xff] }
 0x212   :  { %v2374_v33 = vadd.f32 %v2373_v21, %v2372_v17  ;;  %v5321_v17 = vmax.f32 %v5319_v58, %v5320_v2  ;;  %v5329_v2 = vld [vmem:[#allocation20_spill] sm:$0xff] }
 0x213   :  { %v2226_v3 = vmax.f32 %v2176_v13, 0.0  ;;  %v2177_v34 = vadd.f32 %v4682_v0, %v2120_v56 }
 0x214   :  { %v1466_v24 = vpop.f32.mrb[152].mxu0  ;;  %v2000_v60 = vpop.f32.mrb[152].mxu1 }
 0x215   :  { %v2301_v52 = vmul.f32 %v4979_v53, %v2226_v3  ;;  %v1587_v50 = vmax.f32 %v5314_v36, %v1466_v24  ;;  %v3331_v16 = vpop.f32.mrb[153].mxu0  ;;  %v3439_v10 = vpop.f32.mrb[153].mxu1  ;;  %v2227_v31 = vmax.f32 %v2177_v34, 0.0  ;;  %v5324_v36 = vld [vmem:[#allocation17_spill] sm:$0xff] }
 0x216   :  { %v1469_v43 = vpop.f32.mrb[154].mxu0  ;;  %v2003_v19 = vpop.f32.mrb[154].mxu1 }
 0x217   :  { %v2375_v5 = vsel %vm2327_vm3, %v2301_v52, 0.0  ;;  %v2121_v15 = vmax.f32 %v1587_v50, %v2000_v60  ;;  %v1588_v40 = vmax.f32 %v5317_v8, %v1469_v43  ;;  %v3332_v1 = vpop.f32.mrb[155].mxu0  ;;  %v3440_v25 = vpop.f32.mrb[155].mxu1  ;;  %v2302_v41 = vmul.f32 %v5318_v27, %v2227_v31  ;;  %v5322_v60 = vld [vmem:[#allocation59_spill] sm:$0xff] }
 0x218   :  { %v4990_v62 = vadd.f32 %v2375_v5, %v2374_v33  ;;  %v5325_v50 = vmax.f32 %v5323_v48, %v5324_v36 }
 0x219   :  { %v2178_v38 = vadd.f32 %v4682_v0, %v2121_v15  ;;  %v2122_v26 = vmax.f32 %v1588_v40, %v2003_v19  ;;  %v2383_v33 = vsel %vm2327_vm3, %v2302_v41, 0.0 }
 0x21b   :  { %v2228_v22 = vmax.f32 %v2178_v38, 0.0  ;;  %v2179_v6 = vadd.f32 %v4682_v0, %v2122_v26  ;;  %v5326_v38 = vld [vmem:[#allocation18_spill] sm:$0xff]  ;;  %v5327_v26 = vld [vmem:[#allocation19_spill] sm:$0xff] }
 0x21c   :  { %v1474_v29 = vpop.f32.mrb[156].mxu0  ;;  %v2008_v7 = vpop.f32.mrb[156].mxu1  ;;  %v5328_v27 = vmax.f32 %v5326_v38, %v5327_v26 }
 0x21d   :  { %v2303_v11 = vmul.f32 %v4703_v61, %v2228_v22  ;;  %v2229_v12 = vmax.f32 %v2179_v6, 0.0  ;;  %v1589_v21 = vmax.f32 %v5321_v17, %v1474_v29  ;;  %v3335_v13 = vpop.f32.mrb[157].mxu0  ;;  %v3443_v56 = vpop.f32.mrb[157].mxu1  ;;  %v5330_v17 = vld [vmem:[#allocation21_spill] sm:$0xff] }
 0x21e   :  { %v1477_v3 = vpop.f32.mrb[158].mxu0  ;;  %v2011_v34 = vpop.f32.mrb[158].mxu1 }
 0x21f   :  { %v2384_v24 = vsel %vm2327_vm3, %v2303_v11, 0.0  ;;  %v2304_v52 = vmul.f32 %v5322_v60, %v2229_v12  ;;  %v2123_v35 = vmax.f32 %v1589_v21, %v2008_v7  ;;  %v1590_v61 = vmax.f32 %v5325_v50, %v1477_v3  ;;  %v3336_v16 = vpop.f32.mrb[159].mxu0  ;;  %v3444_v10 = vpop.f32.mrb[159].mxu1 }
 0x220   :  { %v2385_v31 = vadd.f32 %v2384_v24, %v2383_v33  ;;  %v5331_v21 = vmax.f32 %v5329_v2, %v5330_v17  ;;  %v5333_v16 = vld [vmem:[#allocation23_spill] sm:$0xff]  ;;  %v5338_v17 = vld [vmem:[#allocation26_spill] sm:$0xff] }
 0x221   :  { %v2386_v43 = vsel %vm2327_vm3, %v2304_v52, 0.0  ;;  %v2180_v19 = vadd.f32 %v4682_v0, %v2123_v35  ;;  %v2124_v5 = vmax.f32 %v1590_v61, %v2011_v34  ;;  %v5332_v61 = vld [vmem:[#allocation22_spill] sm:$0xff] }
 0x222   :  { %v2387_v15 = vadd.f32 %v2386_v43, %v2385_v31  ;;  %v5334_v10 = vmax.f32 %v5332_v61, %v5333_v16 }
 0x223   :  { %v2230_v55 = vmax.f32 %v2180_v19, 0.0  ;;  %v2181_v4 = vadd.f32 %v4682_v0, %v2124_v5 }
 0x224   :  { %v1482_v8 = vpop.f32.mrb[160].mxu0  ;;  %v2016_v40 = vpop.f32.mrb[160].mxu1 }
 0x225   :  { %v2305_v1 = vmul.f32 %v4726_v18, %v2230_v55  ;;  %v2231_v25 = vmax.f32 %v2181_v4, 0.0  ;;  %v1591_v41 = vmax.f32 %v5328_v27, %v1482_v8  ;;  %v3339_v22 = vpop.f32.mrb[161].mxu0  ;;  %v3447_v6 = vpop.f32.mrb[161].mxu1 }
 0x226   :  { %v1485_v29 = vpop.f32.mrb[162].mxu0  ;;  %v2019_v7 = vpop.f32.mrb[162].mxu1 }
 0x227   :  { %v2388_v11 = vsel %vm2327_vm3, %v2305_v1, 0.0  ;;  %v2306_v12 = vmul.f32 %v4742_v49, %v2231_v25  ;;  %v2125_v58 = vmax.f32 %v1591_v41, %v2016_v40  ;;  %v1592_v13 = vmax.f32 %v5331_v21, %v1485_v29  ;;  %v3340_v56 = vpop.f32.mrb[163].mxu0  ;;  %v3448_v18 = vpop.f32.mrb[163].mxu1  ;;  %v5335_v40 = vld [vmem:[#allocation24_spill] sm:$0xff]  ;;  %v5336_v1 = vld [vmem:[#allocation25_spill] sm:$0xff]  ;;  %v5339_v21 = vld [vmem:[#allocation27_spill] sm:$0xff] }
 0x228   :  { %v2389_v33 = vadd.f32 %v2388_v11, %v2387_v15  ;;  %v5337_v25 = vmax.f32 %v5335_v40, %v5336_v1  ;;  %v5345_v40 = vld [vmem:[#allocation31_spill] sm:$0xff] }
 0x229   :  { %v2390_v3 = vsel %vm2327_vm3, %v2306_v12, 0.0  ;;  %v2182_v34 = vadd.f32 %v4682_v0, %v2125_v58  ;;  %v2126_v24 = vmax.f32 %v1592_v13, %v2019_v7  ;;  %v5340_v13 = vmax.f32 %v5338_v17, %v5339_v21 }
 0x22a   :  { %v2391_v60 = vadd.f32 %v2390_v3, %v2389_v33 }
 0x22b   :  { %v2232_v52 = vmax.f32 %v2182_v34, 0.0  ;;  %v2183_v35 = vadd.f32 %v4682_v0, %v2126_v24 }
 0x22c   :  { %v1490_v48 = vpop.f32.mrb[164].mxu0  ;;  %v2024_v36 = vpop.f32.mrb[164].mxu1 }
 0x22d   :  { %v2307_v49 = vmul.f32 %v4748_v30, %v2232_v52  ;;  %v2233_v50 = vmax.f32 %v2183_v35, 0.0  ;;  %v1593_v31 = vmax.f32 %v5334_v10, %v1490_v48  ;;  %v3343_v43 = vpop.f32.mrb[165].mxu0  ;;  %v3451_v19 = vpop.f32.mrb[165].mxu1  ;;  %v5341_v35 = vld [vmem:[#allocation28_spill] sm:$0xff]  ;;  %v5342_v48 = vld [vmem:[#allocation29_spill] sm:$0xff] }
 0x22e   :  { %v1493_v5 = vpop.f32.mrb[166].mxu0  ;;  %v2027_v15 = vpop.f32.mrb[166].mxu1 }
 0x22f   :  { %v2392_v55 = vsel %vm2327_vm3, %v2307_v49, 0.0  ;;  %v2308_v4 = vmul.f32 %v4764_v63, %v2233_v50  ;;  %v2127_v8 = vmax.f32 %v1593_v31, %v2024_v36  ;;  %v1594_v38 = vmax.f32 %v5337_v25, %v1493_v5  ;;  %v3344_v26 = vpop.f32.mrb[167].mxu0  ;;  %v3452_v30 = vpop.f32.mrb[167].mxu1 }
 0x230   :  { %v2393_v27 = vadd.f32 %v2392_v55, %v2391_v60  ;;  %v5343_v36 = vmax.f32 %v5341_v35, %v5342_v48 }
 0x231   :  { %v2394_v41 = vsel %vm2327_vm3, %v2308_v4, 0.0  ;;  %v2184_v22 = vadd.f32 %v4682_v0, %v2127_v8  ;;  %v2128_v6 = vmax.f32 %v1594_v38, %v2027_v15  ;;  %v5344_v8 = vld [vmem:[#allocation30_spill] sm:$0xff] }
 0x232   :  { %v2395_v29 = vadd.f32 %v2394_v41, %v2393_v27  ;;  %v5346_v1 = vmax.f32 %v5344_v8, %v5345_v40 }
 0x233   :  { %v2234_v7 = vmax.f32 %v2184_v22, 0.0  ;;  %v2185_v11 = vadd.f32 %v4682_v0, %v2128_v6 }
 0x234   :  { %v1498_v12 = vpop.f32.mrb[168].mxu0  ;;  %v2032_v58 = vpop.f32.mrb[168].mxu1 }
 0x235   :  { %v2309_v63 = vmul.f32 %v4776_v37, %v2234_v7  ;;  %v2235_v2 = vmax.f32 %v2185_v11, 0.0  ;;  %v1595_v56 = vmax.f32 %v5340_v13, %v1498_v12  ;;  %v3347_v18 = vpop.f32.mrb[169].mxu0  ;;  %v3455_v33 = vpop.f32.mrb[169].mxu1  ;;  %v5348_v7 = vld [vmem:[#allocation33_spill] sm:$0xff] }
 0x236   :  { %v1501_v3 = vpop.f32.mrb[170].mxu0  ;;  %v2035_v34 = vpop.f32.mrb[170].mxu1 }
 0x237   :  { %v2396_v24 = vsel %vm2327_vm3, %v2309_v63, 0.0  ;;  %v2310_v60 = vmul.f32 %v4793_v44, %v2235_v2  ;;  %v2129_v52 = vmax.f32 %v1595_v56, %v2032_v58  ;;  %v1596_v49 = vmax.f32 %v5343_v36, %v1501_v3  ;;  %v3348_v50 = vpop.f32.mrb[171].mxu0  ;;  %v3456_v37 = vpop.f32.mrb[171].mxu1 }
 0x238   :  { %v2397_v61 = vadd.f32 %v2396_v24, %v2395_v29  ;;  %v5347_v29 = vld [vmem:[#allocation32_spill] sm:$0xff]  ;;  %v5350_v24 = vld [vmem:[#allocation34_spill] sm:$0xff] }
 0x239   :  { %v2398_v16 = vsel %vm2327_vm3, %v2310_v60, 0.0  ;;  %v2186_v10 = vadd.f32 %v4682_v0, %v2129_v52  ;;  %v2130_v31 = vmax.f32 %v1596_v49, %v2035_v34  ;;  %v5349_v11 = vmax.f32 %v5347_v29, %v5348_v7  ;;  %v5351_v60 = vld [vmem:[#allocation35_spill] sm:$0xff] }
 0x23a   :  { %v2399_v43 = vadd.f32 %v2398_v16, %v2397_v61  ;;  %v5352_v52 = vmax.f32 %v5350_v24, %v5351_v60 }
 0x23b   :  { %v2236_v19 = vmax.f32 %v2186_v10, 0.0  ;;  %v2187_v5 = vadd.f32 %v4682_v0, %v2130_v31  ;;  %v5353_v10 = vld [vmem:[#allocation36_spill] sm:$0xff]  ;;  %v5354_v31 = vld [vmem:[#allocation37_spill] sm:$0xff] }
 0x23c   :  { %v1506_v15 = vpop.f32.mrb[172].mxu0  ;;  %v2040_v55 = vpop.f32.mrb[172].mxu1 }
 0x23d   :  { %v2311_v44 = vmul.f32 %v4799_v54, %v2236_v19  ;;  %v2237_v4 = vmax.f32 %v2187_v5, 0.0  ;;  %v1597_v25 = vmax.f32 %v5346_v1, %v1506_v15  ;;  %v3351_v38 = vpop.f32.mrb[173].mxu0  ;;  %v3459_v26 = vpop.f32.mrb[173].mxu1 }
 0x23e   :  { %v1509_v30 = vpop.f32.mrb[174].mxu0  ;;  %v2043_v27 = vpop.f32.mrb[174].mxu1 }
 0x23f   :  { %v2400_v41 = vsel %vm2327_vm3, %v2311_v44, 0.0  ;;  %v2312_v22 = vmul.f32 %v4815_v47, %v2237_v4  ;;  %v2131_v6 = vmax.f32 %v1597_v25, %v2040_v55  ;;  %v1598_v12 = vmax.f32 %v5349_v11, %v1509_v30  ;;  %v3352_v58 = vpop.f32.mrb[175].mxu0  ;;  %v3460_v54 = vpop.f32.mrb[175].mxu1  ;;  %v5356_v30 = vld [vmem:[#allocation38_spill] sm:$0xff] }
 0x240   :  { %v2401_v63 = vadd.f32 %v2400_v41, %v2399_v43  ;;  %v5355_v43 = vmax.f32 %v5353_v10, %v5354_v31 }
 0x241   :  { %v2402_v2 = vsel %vm2327_vm3, %v2312_v22, 0.0  ;;  %v2188_v17 = vadd.f32 %v4682_v0, %v2131_v6  ;;  %v2132_v21 = vmax.f32 %v1598_v12, %v2043_v27  ;;  %v5357_v27 = vld [vmem:[#allocation39_spill] sm:$0xff] }
 0x242   :  { %v2403_v13 = vadd.f32 %v2402_v2, %v2401_v63  ;;  %v5358_v41 = vmax.f32 %v5356_v30, %v5357_v27  ;;  %v5359_v63 = vld [vmem:[#allocation40_spill] sm:$0xff]  ;;  %v5360_v2 = vld [vmem:[#allocation41_spill] sm:$0xff] }
 0x243   :  { %v2238_v56 = vmax.f32 %v2188_v17, 0.0  ;;  %v2189_v18 = vadd.f32 %v4682_v0, %v2132_v21  ;;  %v5361_v17 = vmax.f32 %v5359_v63, %v5360_v2 }
 0x244   :  { %v1514_v33 = vpop.f32.mrb[176].mxu0  ;;  %v2048_v3 = vpop.f32.mrb[176].mxu1 }
 0x245   :  { %v2313_v47 = vmul.f32 %v4821_v9, %v2238_v56  ;;  %v2239_v34 = vmax.f32 %v2189_v18, 0.0  ;;  %v1599_v35 = vmax.f32 %v5352_v52, %v1514_v33  ;;  %v3355_v48 = vpop.f32.mrb[177].mxu0  ;;  %v3463_v36 = vpop.f32.mrb[177].mxu1 }
 0x246   :  { %v1517_v49 = vpop.f32.mrb[178].mxu0  ;;  %v2051_v50 = vpop.f32.mrb[178].mxu1  ;;  %v5362_v48 = vld [vmem:[#allocation42_spill] sm:$0xff]  ;;  %v5363_v36 = vld [vmem:[#allocation43_spill] sm:$0xff] }
 0x247   :  { %v2404_v37 = vsel %vm2327_vm3, %v2313_v47, 0.0  ;;  %v2314_v61 = vmul.f32 %v4837_v14, %v2239_v34  ;;  %v2133_v16 = vmax.f32 %v1599_v35, %v2048_v3  ;;  %v1600_v19 = vmax.f32 %v5355_v43, %v1517_v49  ;;  %v3356_v5 = vpop.f32.mrb[179].mxu0  ;;  %v3464_v9 = vpop.f32.mrb[179].mxu1 }
 0x248   :  { %v2405_v15 = vadd.f32 %v2404_v37, %v2403_v13  ;;  %v5364_v49 = vmax.f32 %v5362_v48, %v5363_v36  ;;  %v5365_v5 = vld [vmem:[#allocation44_spill] sm:$0xff]  ;;  %v5366_v9 = vld [vmem:[#allocation45_spill] sm:$0xff]  ;;  %v5374_v48 = vld [vmem:[#allocation50_spill] sm:$0xff] }
 0x249   :  { %v2406_v55 = vsel %vm2327_vm3, %v2314_v61, 0.0  ;;  %v2190_v44 = vadd.f32 %v4682_v0, %v2133_v16  ;;  %v2134_v4 = vmax.f32 %v1600_v19, %v2051_v50  ;;  %v5375_v36 = vld [vmem:[#allocation51_spill] sm:$0xff] }
 0x24a   :  { %v2407_v8 = vadd.f32 %v2406_v55, %v2405_v15  ;;  %v5367_v15 = vmax.f32 %v5365_v5, %v5366_v9  ;;  %v5377_v5 = vld [vmem:[#allocation52_spill] sm:$0xff]  ;;  %v5378_v9 = vld [vmem:[#allocation53_spill] sm:$0xff] }
 0x24b   :  { %v2240_v40 = vmax.f32 %v2190_v44, 0.0  ;;  %v2191_v1 = vadd.f32 %v4682_v0, %v2134_v4 }
 0x24c   :  { %v1522_v25 = vpop.f32.mrb[180].mxu0  ;;  %v2056_v38 = vpop.f32.mrb[180].mxu1 }
 0x24d   :  { %v2315_v14 = vmul.f32 %v4849_v59, %v2240_v40  ;;  %v2241_v26 = vmax.f32 %v2191_v1, 0.0  ;;  %v1601_v22 = vmax.f32 %v5358_v41, %v1522_v25  ;;  %v3359_v6 = vpop.f32.mrb[181].mxu0  ;;  %v3467_v29 = vpop.f32.mrb[181].mxu1 }
 0x24e   :  { %v1525_v7 = vpop.f32.mrb[182].mxu0  ;;  %v2059_v11 = vpop.f32.mrb[182].mxu1  ;;  %v5369_v6 = vld [vmem:[#allocation47_spill] sm:$0xff] }
 0x24f   :  { %v2408_v12 = vsel %vm2327_vm3, %v2315_v14, 0.0  ;;  %v2316_v58 = vmul.f32 %v4866_v32, %v2241_v26  ;;  %v2135_v54 = vmax.f32 %v1601_v22, %v2056_v38  ;;  %v1602_v21 = vmax.f32 %v5361_v17, %v1525_v7  ;;  %v3360_v13 = vpop.f32.mrb[183].mxu0  ;;  %v3468_v59 = vpop.f32.mrb[183].mxu1  ;;  %v5094_v14 = vld [vmem:[%s5160_s2] ss:$0 sm:$0xff]  ;;  %v5368_v22 = vld [vmem:[#allocation46_spill] sm:$0xff] }
 0x250   :  { %v2409_v56 = vadd.f32 %v2408_v12, %v2407_v8  ;;  %v5370_v29 = vmax.f32 %v5368_v22, %v5369_v6  ;;  %v5371_v17 = vld [vmem:[#allocation48_spill] sm:$0xff] }
 0x251   :  { %v2410_v18 = vsel %vm2327_vm3, %v2316_v58, 0.0  ;;  %v2192_v33 = vadd.f32 %v4682_v0, %v2135_v54  ;;  %v2136_v3 = vmax.f32 %v1602_v21, %v2059_v11  ;;  %v5372_v21 = vld [vmem:[#allocation49_spill] sm:$0xff] }
 0x252   :  { %v2411_v47 = vadd.f32 %v2410_v18, %v2409_v56  ;;  %v5373_v13 = vmax.f32 %v5371_v17, %v5372_v21 }
 0x253   :  { %v2242_v34 = vmax.f32 %v2192_v33, 0.0  ;;  %v2193_v24 = vadd.f32 %v4682_v0, %v2136_v3 }
 0x254   :  { %v1530_v60 = vpop.f32.mrb[184].mxu0  ;;  %v2064_v52 = vpop.f32.mrb[184].mxu1 }
 0x255   :  { %v2317_v32 = vmul.f32 %v4872_v57, %v2242_v34  ;;  %v2243_v35 = vmax.f32 %v2193_v24, 0.0  ;;  %v1603_v50 = vmax.f32 %v5364_v49, %v1530_v60  ;;  %v3363_v37 = vpop.f32.mrb[185].mxu0  ;;  %v3471_v61 = vpop.f32.mrb[185].mxu1  ;;  %v5376_v49 = vmax.f32 %v5374_v48, %v5375_v36 }
 0x256   :  { %v1533_v16 = vpop.f32.mrb[186].mxu0  ;;  %v2067_v10 = vpop.f32.mrb[186].mxu1 }
 0x257   :  { %v2412_v31 = vsel %vm2327_vm3, %v2317_v32, 0.0  ;;  %v2318_v43 = vmul.f32 %v4888_v20, %v2243_v35  ;;  %v2137_v19 = vmax.f32 %v1603_v50, %v2064_v52  ;;  %v1604_v55 = vmax.f32 %v5367_v15, %v1533_v16  ;;  %v3364_v44 = vpop.f32.mrb[187].mxu0  ;;  %v3472_v57 = vpop.f32.mrb[187].mxu1 }
 0x258   :  { %v2413_v4 = vadd.f32 %v2412_v31, %v2411_v47  ;;  %v5379_v15 = vmax.f32 %v5377_v5, %v5378_v9 }
 0x259   :  { %v2414_v8 = vsel %vm2327_vm3, %v2318_v43, 0.0  ;;  %v2194_v40 = vadd.f32 %v4682_v0, %v2137_v19  ;;  %v2138_v1 = vmax.f32 %v1604_v55, %v2067_v10 }
 0x25a   :  { %v2415_v25 = vadd.f32 %v2414_v8, %v2413_v4 }
 0x25b   :  { %v2244_v38 = vmax.f32 %v2194_v40, 0.0  ;;  %v2195_v20 = vadd.f32 %v5094_v14, %v2138_v1 }
 0x25c   :  { %v1538_v26 = vpop.f32.mrb[188].mxu0  ;;  %v2072_v30 = vpop.f32.mrb[188].mxu1 }
 0x25d   :  { %v2319_v27 = vmul.f32 %v4894_v39, %v2244_v38  ;;  %v2245_v41 = vmax.f32 %v2195_v20, 0.0  ;;  %v1605_v7 = vmax.f32 %v5370_v29, %v1538_v26  ;;  %v3367_v0 = vpop.f32.mrb[189].mxu0  ;;  %v3475_v11 = vpop.f32.mrb[189].mxu1 }
 0x25e   :  { %v1541_v12 = vpop.f32.mrb[190].mxu0  ;;  %v2075_v58 = vpop.f32.mrb[190].mxu1 }
 0x25f   :  { %v2416_v54 = vsel %vm2327_vm3, %v2319_v27, 0.0  ;;  %v2320_v63 = vmul.f32 %v4910_v23, %v2245_v41  ;;  %v2139_v2 = vmax.f32 %v1605_v7, %v2072_v30  ;;  %v1606_v59 = vmax.f32 %v5373_v13, %v1541_v12  ;;  %v3368_v56 = vpop.f32.mrb[191].mxu0  ;;  %v3476_v39 = vpop.f32.mrb[191].mxu1  ;;  %v5380_v27 = vld [vmem:[#allocation54_spill] sm:$0xff]  ;;  %v5381_v41 = vld [vmem:[#allocation55_spill] sm:$0xff] }
 0x260   :  { %v2417_v18 = vadd.f32 %v2416_v54, %v2415_v25  ;;  %v5382_v22 = vmax.f32 %v5380_v27, %v5381_v41 }
 0x261   :  { %v2418_v33 = vsel %vm2327_vm3, %v2320_v63, 0.0  ;;  %v2196_v3 = vadd.f32 %v5094_v14, %v2139_v2  ;;  %v2140_v47 = vmax.f32 %v1606_v59, %v2075_v58  ;;  %v5383_v63 = vld [vmem:[#allocation56_spill] sm:$0xff]  ;;  %v5384_v2 = vld [vmem:[#allocation57_spill] sm:$0xff] }
 0x262   :  { %v2419_v34 = vadd.f32 %v2418_v33, %v2417_v18  ;;  %v5385_v17 = vmax.f32 %v5383_v63, %v5384_v2  ;;  %v2377_v33 = vrot.slane %v4990_v62, 4 }
 0x263   :  { %v2246_v24 = vmax.f32 %v2196_v3, 0.0  ;;  %v2197_v60 = vadd.f32 %v5094_v14, %v2140_v47 }
 0x264   :  { %v1546_v52 = vpop.f32.mrb[192].mxu0  ;;  %v2080_v32 = vpop.f32.mrb[192].mxu1 }
 0x265   :  { %v2321_v23 = vmul.f32 %v4916_v51, %v2246_v24  ;;  %v2247_v35 = vmax.f32 %v2197_v60, 0.0  ;;  %v1607_v50 = vmax.f32 %v5376_v49, %v1546_v52  ;;  %v3371_v37 = vpop.f32.mrb[193].mxu0  ;;  %v3479_v61 = vpop.f32.mrb[193].mxu1  ;;  %v2378_v60 = vadd.f32 %v2377_v33, %v4990_v62 }
 0x266   :  { %v1549_v16 = vpop.f32.mrb[194].mxu0  ;;  %v2083_v10 = vpop.f32.mrb[194].mxu1 }
 0x267   :  { %v2420_v31 = vsel %vm2327_vm3, %v2321_v23, 0.0  ;;  %v2322_v43 = vmul.f32 %v4932_v45, %v2247_v35  ;;  %v2141_v19 = vmax.f32 %v1607_v50, %v2080_v32  ;;  %v1608_v55 = vmax.f32 %v5379_v15, %v1549_v16  ;;  %v3372_v44 = vpop.f32.mrb[195].mxu0  ;;  %v3480_v51 = vpop.f32.mrb[195].mxu1 }
 0x268   :  { %v2421_v57 = vadd.f32 %v2420_v31, %v2419_v34  ;;  %v2379_v48 = vrot.slane %v2378_v60, 2 }
 0x269   :  { %v2422_v4 = vsel %vm2327_vm3, %v2322_v43, 0.0  ;;  %v2198_v8 = vadd.f32 %v5094_v14, %v2141_v19  ;;  %v2142_v40 = vmax.f32 %v1608_v55, %v2083_v10 }
 0x26a   :  { %v2423_v1 = vadd.f32 %v2422_v4, %v2421_v57  ;;  %v2380_v50 = vadd.f32 %v2379_v48, %v2378_v60 }
 0x26b   :  { %v2248_v25 = vmax.f32 %v2198_v8, 0.0  ;;  %v2199_v38 = vadd.f32 %v5094_v14, %v2142_v40 }
 0x26c   :  { %v1554_v20 = vpop.f32.mrb[196].mxu0  ;;  %v2088_v26 = vpop.f32.mrb[196].mxu1  ;;  %v2381_v16 = vrot.slane %v2380_v50, 1 }
 0x26d   :  { %v2323_v45 = vmul.f32 %v4938_v46, %v2248_v25  ;;  %v2249_v30 = vmax.f32 %v2199_v38, 0.0  ;;  %v1609_v6 = vmax.f32 %v5382_v22, %v1554_v20  ;;  %v3375_v29 = vpop.f32.mrb[197].mxu0  ;;  %v3483_v7 = vpop.f32.mrb[197].mxu1 }
 0x26e   :  { %v1557_v0 = vpop.f32.mrb[198].mxu0  ;;  %v2091_v11 = vpop.f32.mrb[198].mxu1 }
 0x26f   :  { %v2424_v12 = vsel %vm2327_vm3, %v2323_v45, 0.0  ;;  %v2324_v58 = vmul.f32 %v4957_v42, %v2249_v30  ;;  %v2143_v54 = vmax.f32 %v1609_v6, %v2088_v26  ;;  %v1610_v21 = vmax.f32 %v5385_v17, %v1557_v0  ;;  %v3376_v13 = vpop.f32.mrb[199].mxu0  ;;  %v3484_v46 = vpop.f32.mrb[199].mxu1 }
 0x270   :  { %v2425_v59 = vadd.f32 %v2424_v12, %v2423_v1 }
 0x271   :  { %v2426_v56 = vsel %vm2327_vm3, %v2324_v58, 0.0  ;;  %v2200_v39 = vadd.f32 %v5094_v14, %v2143_v54  ;;  %v2144_v18 = vmax.f32 %v1610_v21, %v2091_v11 }
 0x272   :  { %v2427_v3 = vadd.f32 %v2426_v56, %v2425_v59 }
 0x273   :  { %v2250_v47 = vmax.f32 %v2200_v39, 0.0  ;;  %v2201_v34 = vadd.f32 %v5094_v14, %v2144_v18 }
 0x275   :  { %v2325_v42 = vmul.f32 %v4963_v28, %v2250_v47  ;;  %v2251_v24 = vmax.f32 %v2201_v34, 0.0  ;;  %v2382_v28 = vadd.f32 %v2381_v16, %v2380_v50 }
 0x277   :  { %v2428_v52 = vsel %vm2327_vm3, %v2325_v42, 0.0  ;;  %v2326_v32 = vmul.f32 %v4979_v53, %v2251_v24  ;;  %v2919_v53 = vld [vmem:[%s5163_s5] ss:$0 sm:$0xff]  ;;  %s2556_s5 = sshll.u32 %s3681_s9, 4  ;;  %s2557_s5 = int_to_ptr.vmem [resolvable:$true] %s2556_s5 }
 0x278   :  { %v2429_v23 = vadd.f32 %v2428_v52, %v2427_v3  ;;  %s3653_s10 = scalar_lea.vmem %s2557_s5, 32  ;;  %p3658_p1 = scmp.lt.s32.totalorder %s2557_s5, %s2557_s5 }
 0x279   :  { %v2430_v35 = vsel %vm2327_vm3, %v2326_v32, 0.0  ;;  %p3654_p0 = scmp.ne.s32.totalorder %s2557_s5, %s3653_s10  ;;  %p3659_p2 = scmp.lt.s32.totalorder %s3653_s10, %s3653_s10 }
 0x27a   :  { %v2431_v36 = vadd.f32 %v2430_v35, %v2429_v23 }
 0x27b   :  { %p3660_p3 = por %p3659_p2, %p3658_p1 }
 0x27c   :  { %v2432_v49 = vrot.slane %v2431_v36, 4 }
 0x27d   :  { %p3661_p4 = pnand %p3660_p3, %p3654_p0 }
 0x27e   :  { %v2433_v37 = vadd.f32 %v2432_v49, %v2431_v36 }
 0x280   :  { %v2434_v61 = vrot.slane %v2433_v37, 2 }
 0x282   :  { %v2435_v14 = vadd.f32 %v2434_v61, %v2433_v37 }
 0x284   :  { %v2436_v10 = vrot.slane %v2435_v14, 1 }
 0x286   :  { %v2437_v31 = vadd.f32 %v2436_v10, %v2435_v14 }
 0x288   :  { %v2463_v62 = vsel %vm2462_vm4, %v2437_v31, %v2382_v28 }
 0x289   :  { %3516 = vmatmul.mubr.msk.f32.vlgmr.msra.gmra.mrb[200].mxu0 %vm2327_vm3, %v2463_v62 }
 0x35c   :  { %v2532_v43 = vpop.f32.mrb[200].mxu0 }
 0x35d   :  { %v2533_v19 = vadd.f32 %v2919_v53, %v2532_v43  ;;  %v3517_v5 = vpop.f32.mrb[201].mxu0 }
 0x35f   :  { %v2537_v9 = vsel %vm2536_vm5, %v2533_v19, -inf }
 0x360   :  { %2538 = vmax.xlane.f32.xlu0 %v2537_v9 }
 0x3ed   :  { %v2539_v15 = vpop.xlane.xlu0 %2538 }
 0x3ee   :  { %v2540_v55 = vsub.f32 %v2533_v19, %v2539_v15 }
 0x3f0   :  { %v2541_v44 = vmul.f32 1.442695, %v2540_v55 }
 0x3f2   :  { %3648 = vpow2.f32 %v2541_v44 }
 0x3fc   :  { %v3649_v51 = vpop.eup %3648 }
 0x3fd   :  { %v2543_v57 = vsel %vm2536_vm5, %v3649_v51, 0.0 }
 0x3fe   :  { %2544 = vadd.xlane.f32.xlu0 %v2543_v57 }
 0x48b   :  { %v2545_v4 = vpop.xlane.xlu0 %2544 }
 0x48c   :  { %3650 = vlog2.f32 %v2545_v4 }
 0x496   :  { %v3651_v8 = vpop.eup %3650 }
 0x497   :  { %v2547_v40 = vmul.f32 0.6931472, %v3651_v8 }
 0x499   :  { %v2548_v1 = vsub.f32 %v2540_v55, %v2547_v40 }
 0x49b   :  { %2549 = vst.msk [vmem:[#allocation2] sm:$0x3] %vm2536_vm5, %v2548_v1 }
 0x49c   :  { %3664 = shalt.err (!%p3661_p4)
}
 0x49d   :  { %s3665_s13 = scalar_lea.hbm %s5164_s6, 32 }
 0x49e   :  { %p3666_p5 = scmp.ne.s32.totalorder %s5164_s6, %s3665_s13  ;;  %p3669_p6 = scmp.lt.u32.totalorder %s3665_s13, %s5164_s6 }
 0x4a0   :  { %p3671_p7 = pnand %p3669_p6, %p3666_p5 }
 0x4a2   :  { %3674 = shalt.err (!%p3671_p7)
}
 0x4a3   :  { %2559 = dma.vmem_to_hbm [thread:$0]  %s2557_s5, 32, %s5164_s6, [#allocation3]  }
 0x4a4   :  { %3675 = dma.done.wait [#allocation3], 32  }
 0x4a5   :  { %3676 = vsyncadd [#allocation3], 4294967264 }
 0x4a6   :  { %2563 = vsyncpa [#allocation3], 1 }

</bundles_post_ra>
